<compile_context>
chip_gen: v7x
topology: tpu7x:2x2x1
jax: 0.10.0
libtpu: 0.0.40
codegen_flags: <defaults>
</compile_context>

<pallas_src>
import numpy as np
import jax
import jax.numpy as jnp
from jax import lax
from jax.experimental import pallas as pl
from jax.experimental.pallas import tpu as pltpu


# --------------------------- small helpers ----------------------------------
def _round_up(x, m):
    return ((x + m - 1) // m) * m


def _identity(n, dtype):
    """n x n identity built from 2-D broadcasted_iota (1-D iota is unsupported)."""
    rows = lax.broadcasted_iota(jnp.int32, (n, n), 0)
    cols = lax.broadcasted_iota(jnp.int32, (n, n), 1)
    return jnp.where(rows == cols, jnp.float32(1), jnp.float32(0)).astype(dtype)


def _flip2d(x):
    """Exact (R, C) -> (C, R) layout flip.  Small shapes use the MXU
    identity-matmul trick (exact, proven lowering); large shapes use an XLU
    transpose so we avoid O(dim^2) MACs and a dim^2 identity in VMEM."""
    r, c = x.shape
    if max(r, c) >= 512:
        return jnp.transpose(x)
    eye = _identity(c, jnp.float32)
    return lax.dot_general(eye, x, (((1,), (1,)), ((), ())),
                           preferred_element_type=jnp.float32)


def _vmem_limit_bytes():
    """Per-generation scoped-VMEM limit: ~3/4 of physical VMEM, capped at
    100 MiB  =>  ~96 MiB on 128 MiB v5e/v6e, 48 MiB on 64 MiB v7x."""
    cap = 64 * 1024 * 1024                      # conservative (v7x-sized) fallback
    try:
        info = pltpu.get_tpu_info()
        cap = int(getattr(info, "vmem_capacity_bytes", cap) or cap)
    except Exception:
        pass
    return int(min(100 * 1024 * 1024, (cap * 3) // 4))


def _pick_row_tile(n, f, in_itemsize, vmem_limit):
    """Largest row tile TM (multiple of 8, divisor of N, <= 1024) whose VMEM
    footprint -- double-buffered lane-padded input tiles, double-buffered
    resident weights and the f32 activations incl. the 2F hidden -- fits under
    the scoped-VMEM limit with headroom."""
    if n % 8 != 0:
        # TODO(synk): pad/mask ragged N instead of falling back to one full block.
        return n
    budget = (vmem_limit * 4) // 5
    rl = lambda x: _round_up(x, 128)            # lane padding
    rs = lambda x: _round_up(x, 8)              # sublane padding
    # Resident weight/bias blocks, x2: BlockSpec double-buffers even
    # constant-index blocks.
    weights = 2 * 4 * (rs(f) * rl(2 * f) + rs(1) * rl(2 * f)
                       + rs(2 * f) * rl(f) + rs(1) * rl(f))
    # Per-row bytes: 2 inputs x 2 pipeline buffers (lane-padded, native dtype)
    # + f32 activations (|e|, 2F hidden, sigmoid weights, weighted error)
    # + (1, TM) f32 output x 2 buffers.
    per_row = (2 * 2 * rl(f) * in_itemsize
               + 4 * (3 * rl(f) + rl(2 * f))
               + 2 * 4)
    cap = (budget - weights) // max(per_row, 1)
    cap = max(8, min((cap // 8) * 8, n, 1024))
    best = 8
    for tm in range(8, cap + 1, 8):
        if n % tm == 0:
            best = tm
    return best


def _pick_batch_block(b):
    """Split the batch only when it overflows the 128 lanes; splitting earlier
    just reruns the serial T-loop on 1-TC v5e/v6e for zero benefit."""
    if b > 128 and b % 2 == 0:
        return b // 2
    return b


# ----------------------------- Kernel A ------------------------------------
# recon_error -> Linear(F,2F) -> ReLU -> Linear(2F,F) -> Sigmoid -> weighted mean
def error_weight_kernel(o_ref, r_ref, w1_ref, b1_ref, w2_ref, b2_ref, var_ref):
    f = o_ref.shape[1]
    f32 = jnp.float32
    # Native-dtype inputs (e.g. bf16) are cast to f32 in-register: halves HBM
    # traffic on this mem-bound kernel vs. upcasting in the wrapper.
    e = jnp.abs(o_ref[...].astype(f32) - r_ref[...].astype(f32))          # (TM, F)
    if f >= 256:
        # MXU-bound regime: bf16 operands (f32 accumulation) double matmul rate.
        h = jnp.dot(e.astype(jnp.bfloat16), w1_ref[...].astype(jnp.bfloat16),
                    preferred_element_type=f32) + b1_ref[...]
        h = jnp.maximum(h, 0.0)                                            # ReLU
        w = jax.nn.sigmoid(
            jnp.dot(h.astype(jnp.bfloat16), w2_ref[...].astype(jnp.bfloat16),
                    preferred_element_type=f32) + b2_ref[...])
    else:
        h = jnp.dot(e, w1_ref[...], preferred_element_type=f32) + b1_ref[...]
        h = jnp.maximum(h, 0.0)                                            # ReLU
        w = jax.nn.sigmoid(
            jnp.dot(h, w2_ref[...], preferred_element_type=f32) + b2_ref[...])
    we = e * w                                                             # (TM, F)
    # Row mean as an NT matmul: ones(1,F) . we(TM,F)^T -> (1, TM), directly
    # lane-dense (no cross-lane relayout, unmasked store).
    ones_row = jnp.ones((1, f), f32)
    row_sums = lax.dot_general(ones_row, we, (((1,), (1,)), ((), ())),
                               preferred_element_type=f32)                 # (1, TM)
    var_ref[...] = row_sums * (1.0 / f)


# ----------------------------- Kernel B ------------------------------------
# LSTM(input=1, hidden=H, batch_first) + Linear(H,1) + sigmoid(var + temp)
# Weights arrive pre-transposed AND gate-permuted to [i, f, o, g]:
#   wih (4H,1), whh (4H,H), b (4H,1), wsc (H,1).
def lstm_score_kernel(var_ref, wih_ref, whh_ref, b_ref, wsc_ref, bsc_ref,
                      out_ref, xg_ref, temp_ref):
    bb, t_len = var_ref.shape
    h_dim = whh_ref.shape[1]
    f32 = jnp.float32
    hoist_xg = (xg_ref.ndim == 3)      # (T,4H,BB) precomputed gates vs (T,BB) raw x

    wih = wih_ref[...]                 # (4H, 1)
    whh = whh_ref[...]                 # (4H, H)
    b = b_ref[...]                     # (4H, 1)
    wsc = wsc_ref[...]                 # (H, 1)

    # (BB,T) -> (T,BB) time-major flip (MXU identity trick / XLU transpose).
    xtb = _flip2d(var_ref[...].astype(f32))                                # (T, BB)
    if hoist_xg:
        # Hoist input-to-hidden term + bias off the serial critical path.
        xg_ref[...] = wih[None, :, :] * xtb[:, None, :] + b[None, :, :]    # (T,4H,BB)
    else:
        xg_ref[...] = xtb                                                  # (T, BB)

    def step(t, carry):
        h, c = carry                                                       # (H, BB)
        rec = jnp.dot(whh, h, preferred_element_type=f32)                  # (4H, BB)
        if hoist_xg:
            gates = xg_ref[t] + rec
        else:
            gates = wih * xg_ref[pl.ds(t, 1), :] + rec + b
        # Gate rows host-permuted to [i, f, o, g]: one sigmoid over a contiguous
        # (3H, BB) slab + one tanh -> shorter per-step EUP dispatch chain.
        sig = jax.nn.sigmoid(gates[0:3 * h_dim, :])
        i_g = sig[0:h_dim, :]
        f_g = sig[h_dim:2 * h_dim, :]
        o_g = sig[2 * h_dim:3 * h_dim, :]
        g_g = jnp.tanh(gates[3 * h_dim:4 * h_dim, :])
        c = f_g * c + i_g * g_g
        h = o_g * jnp.tanh(c)
        # Temporal-scorer projection per step: sublane reduce -> XLU (idle in
        # the recurrence); bounds scratch to (T,BB) instead of (T,H,BB).
        temp_ref[pl.ds(t, 1), :] = jnp.sum(wsc * h, axis=0, keepdims=True)
        return (h, c)

    zeros = jnp.zeros((h_dim, bb), f32)
    lax.fori_loop(0, t_len, step, (zeros, zeros), unroll=(t_len <= 32))

    # Hoisted epilogue: nothing kept live across the loop; re-read VMEM.
    temp_bt = _flip2d(temp_ref[...])                                       # (BB, T)
    out_ref[...] = jax.nn.sigmoid(var_ref[...].astype(f32) + temp_bt + bsc_ref[...])


# ----------------------------- Wrapper --------------------------------------
def anomaly_score(original, reconstructed, p):
    B, T, F = original.shape
    H = p["w_hh"].shape[0]
    N = B * T
    vlim = _vmem_limit_bytes()

    # Kernel A inputs keep their native dtype (no wrapper upcast).
    o2 = original.reshape(N, F)
    r2 = reconstructed.reshape(N, F)
    itemsize = jnp.dtype(original.dtype).itemsize

    TM = _pick_row_tile(N, F, itemsize, vlim)
    n_tiles = N // TM

    # var_anomaly_score, lane-dense (n_tiles, TM); row-major order == flat (B*T,).
    var_tiles = pl.pallas_call(
        error_weight_kernel,
        out_shape=jax.ShapeDtypeStruct((n_tiles, TM), jnp.float32),
        grid=(n_tiles,),
        in_specs=[
            pl.BlockSpec((TM, F), lambda i: (i, 0)),
            pl.BlockSpec((TM, F), lambda i: (i, 0)),
            pl.BlockSpec((F, 2 * F), lambda i: (0, 0)),
            pl.BlockSpec((1, 2 * F), lambda i: (0, 0)),
            pl.BlockSpec((2 * F, F), lambda i: (0, 0)),
            pl.BlockSpec((1, F), lambda i: (0, 0)),
        ],
        out_specs=pl.BlockSpec((1, TM), lambda i: (i, 0)),
        compiler_params=pltpu.CompilerParams(
            dimension_semantics=("parallel",), vmem_limit_bytes=vlim),
    )(o2, r2, p["w1"], p["b1"], p["w2"], p["b2"])

    var_bt = var_tiles.reshape(B, T)     # free (row-major) -> no transpose glue

    # Pre-transposed LSTM weights (gates on sublanes, batch on lanes), with gate
    # rows permuted host-side from PyTorch [i,f,g,o] to [i,f,o,g] so the three
    # sigmoid gates are contiguous.  Exact and free.
    perm = np.concatenate([np.arange(0, H), np.arange(H, 2 * H),
                           np.arange(3 * H, 4 * H), np.arange(2 * H, 3 * H)])
    wih_c = jnp.transpose(p["w_ih"])[perm]     # (4H, 1)
    whh_c = jnp.transpose(p["w_hh"])[perm]     # (4H, H)
    b_c = jnp.transpose(p["b_lstm"])[perm]     # (4H, 1)

    BB = _pick_batch_block(B)
    nb = B // BB

    # Precompute the input-gate term into a (T,4H,BB) scratch when it fits;
    # otherwise fall back to a compact (T,BB) time-major x scratch (in-loop term).
    hoist_bytes = T * 4 * H * _round_up(BB, 128) * 4
    if hoist_bytes <= vlim // 4:
        xg_scratch = pltpu.VMEM((T, 4 * H, BB), jnp.float32)
    else:
        xg_scratch = pltpu.VMEM((T, BB), jnp.float32)

    out = pl.pallas_call(
        lstm_score_kernel,
        out_shape=jax.ShapeDtypeStruct((B, T), jnp.float32),
        grid=(nb,),
        in_specs=[
            pl.BlockSpec((BB, T), lambda i: (i, 0)),
            pl.BlockSpec((4 * H, 1), lambda i: (0, 0)),
            pl.BlockSpec((4 * H, H), lambda i: (0, 0)),
            pl.BlockSpec((4 * H, 1), lambda i: (0, 0)),
            pl.BlockSpec((H, 1), lambda i: (0, 0)),
            pl.BlockSpec((1, 1), lambda i: (0, 0)),
        ],
        out_specs=pl.BlockSpec((BB, T), lambda i: (i, 0)),
        scratch_shapes=[
            xg_scratch,                              # hoisted gates / time-major x
            pltpu.VMEM((T, BB), jnp.float32),        # per-step temporal score
        ],
        compiler_params=pltpu.CompilerParams(
            dimension_semantics=("parallel",), vmem_limit_bytes=vlim),
    )(var_bt, wih_c, whh_c, b_c, p["w_sc"], p["b_sc"])

    return out                                       # (B, T)


# ----------------------------- Params & reference ---------------------------
def init_params(key, F, H=8):
    ks = jax.random.split(key, 9)
    s = 0.1
    return dict(
        w1=jax.random.normal(ks[0], (F, 2 * F), jnp.float32) * s,      # Linear(F,2F).weight.T
        b1=jax.random.normal(ks[1], (1, 2 * F), jnp.float32) * s,
        w2=jax.random.normal(ks[2], (2 * F, F), jnp.float32) * s,      # Linear(2F,F).weight.T
        b2=jax.random.normal(ks[3], (1, F), jnp.float32) * s,
        w_ih=jax.random.normal(ks[4], (1, 4 * H), jnp.float32) * s,    # LSTM weight_ih_l0.T
        w_hh=jax.random.normal(ks[5], (H, 4 * H), jnp.float32) * s,    # LSTM weight_hh_l0.T
        b_lstm=jax.random.normal(ks[6], (1, 4 * H), jnp.float32) * s,  # bias_ih + bias_hh
        w_sc=jax.random.normal(ks[7], (H, 1), jnp.float32) * s,        # scorer weight.T
        b_sc=jax.random.normal(ks[8], (1, 1), jnp.float32) * s,
    )


def reference(original, reconstructed, p):
    e = jnp.abs(original - reconstructed)
    h = jax.nn.relu(e @ p["w1"] + p["b1"][0])
    w = jax.nn.sigmoid(h @ p["w2"] + p["b2"][0])
    var = jnp.mean(e * w, axis=-1, keepdims=True)              # (B, T, 1)
    H = p["w_hh"].shape[0]
    B = var.shape[0]

    def step(carry, x_t):
        h_, c_ = carry
        gates = x_t * p["w_ih"] + h_ @ p["w_hh"] + p["b_lstm"]
        i_g = jax.nn.sigmoid(gates[:, :H])
        f_g = jax.nn.sigmoid(gates[:, H:2 * H])
        g_g = jnp.tanh(gates[:, 2 * H:3 * H])
        o_g = jax.nn.sigmoid(gates[:, 3 * H:])
        c_ = f_g * c_ + i_g * g_g
        h_ = o_g * jnp.tanh(c_)
        return (h_, c_), h_

    xs = jnp.transpose(var, (1, 0, 2))                          # (T, B, 1)
    _, hs = lax.scan(step, (jnp.zeros((B, H)), jnp.zeros((B, H))), xs)
    temp = hs @ p["w_sc"] + p["b_sc"]                           # (T, B, 1)
    return jnp.transpose(jax.nn.sigmoid(xs + temp)[..., 0], (1, 0))  # (B, T)


if __name__ == "__main__":
    B, T, F = 2, 8, 32
    key = jax.random.PRNGKey(0)
    k1, k2, k3 = jax.random.split(key, 3)
    original = jax.random.normal(k1, (B, T, F), jnp.float32)
    reconstructed = original + 0.3 * jax.random.normal(k2, (B, T, F), jnp.float32)
    params = init_params(k3, F)

    score_fn = jax.jit(anomaly_score)
    out = jax.block_until_ready(score_fn(original, reconstructed, params))

    ref = reference(original, reconstructed, params)
    assert out.shape == (B, T)
    np.testing.assert_allclose(np.asarray(out), np.asarray(ref), atol=5e-3, rtol=5e-3)
    print("KERNEL_OK")
</pallas_src>

<mosaic_0001>
module attributes {stable_mosaic.version = 11 : i64} {
  func.func @error_weight_kernel(%arg0: i32, %arg1: memref<16x32xf32, #tpu.memory_space<vmem>>, %arg2: memref<16x32xf32, #tpu.memory_space<vmem>>, %arg3: memref<32x64xf32, #tpu.memory_space<vmem>>, %arg4: memref<1x64xf32, #tpu.memory_space<vmem>>, %arg5: memref<64x32xf32, #tpu.memory_space<vmem>>, %arg6: memref<1x32xf32, #tpu.memory_space<vmem>>, %arg7: memref<1x16xf32, #tpu.memory_space<vmem>>) attributes {dimension_semantics = [#tpu.dimension_semantics<parallel>], iteration_bounds = array<i64: 1>, scalar_prefetch = 0 : i64, scratch_operands = 0 : i64, tpu.core_type = #tpu.core_type<tc>, window_params = [{transform_indices = @transform_0, window_bounds = array<i64: 16, 32>}, {transform_indices = @transform_1, window_bounds = array<i64: 16, 32>}, {pipeline_mode = #tpu.pipeline_mode<synchronous>, transform_indices = @transform_2, window_bounds = array<i64: 32, 64>}, {pipeline_mode = #tpu.pipeline_mode<synchronous>, transform_indices = @transform_3, window_bounds = array<i64: 1, 64>}, {pipeline_mode = #tpu.pipeline_mode<synchronous>, transform_indices = @transform_4, window_bounds = array<i64: 64, 32>}, {pipeline_mode = #tpu.pipeline_mode<synchronous>, transform_indices = @transform_5, window_bounds = array<i64: 1, 32>}, {transform_indices = @transform_6, window_bounds = array<i64: 1, 16>}]} {
    %c0 = arith.constant 0 : index
    %c0_0 = arith.constant 0 : index
    %0 = vector.load %arg1[%c0, %c0_0] : memref<16x32xf32, #tpu.memory_space<vmem>>, vector<16x32xf32>
    %c0_1 = arith.constant 0 : index
    %c0_2 = arith.constant 0 : index
    %1 = vector.load %arg2[%c0_1, %c0_2] : memref<16x32xf32, #tpu.memory_space<vmem>>, vector<16x32xf32>
    %2 = arith.subf %0, %1 : vector<16x32xf32>
    %3 = math.absf %2 : vector<16x32xf32>
    %c0_3 = arith.constant 0 : index
    %c0_4 = arith.constant 0 : index
    %4 = vector.load %arg3[%c0_3, %c0_4] : memref<32x64xf32, #tpu.memory_space<vmem>>, vector<32x64xf32>
    %cst = arith.constant dense<0.000000e+00> : vector<16x64xf32>
    %5 = tpu.matmul %3, %4, %cst {dimension_numbers = #tpu.dot_dimension_numbers<[1], [0], [0], [1], [0, 0, 1, 1], [], []>} : vector<16x32xf32>, vector<32x64xf32>, vector<16x64xf32> -> vector<16x64xf32>
    %c0_5 = arith.constant 0 : index
    %c0_6 = arith.constant 0 : index
    %6 = vector.load %arg4[%c0_5, %c0_6] : memref<1x64xf32, #tpu.memory_space<vmem>>, vector<1x64xf32>
    %7 = vector.broadcast %6 : vector<1x64xf32> to vector<16x64xf32>
    %8 = arith.addf %5, %7 : vector<16x64xf32>
    %cst_7 = arith.constant 0.000000e+00 : f32
    %9 = vector.broadcast %cst_7 : f32 to vector<16x64xf32>
    %10 = arith.maximumf %8, %9 : vector<16x64xf32>
    %c0_8 = arith.constant 0 : index
    %c0_9 = arith.constant 0 : index
    %11 = vector.load %arg5[%c0_8, %c0_9] : memref<64x32xf32, #tpu.memory_space<vmem>>, vector<64x32xf32>
    %cst_10 = arith.constant dense<0.000000e+00> : vector<16x32xf32>
    %12 = tpu.matmul %10, %11, %cst_10 {dimension_numbers = #tpu.dot_dimension_numbers<[1], [0], [0], [1], [0, 0, 1, 1], [], []>} : vector<16x64xf32>, vector<64x32xf32>, vector<16x32xf32> -> vector<16x32xf32>
    %c0_11 = arith.constant 0 : index
    %c0_12 = arith.constant 0 : index
    %13 = vector.load %arg6[%c0_11, %c0_12] : memref<1x32xf32, #tpu.memory_space<vmem>>, vector<1x32xf32>
    %14 = vector.broadcast %13 : vector<1x32xf32> to vector<16x32xf32>
    %15 = arith.addf %12, %14 : vector<16x32xf32>
    %16 = arith.negf %15 : vector<16x32xf32>
    %17 = math.exp %16 : vector<16x32xf32>
    %cst_13 = arith.constant 1.000000e+00 : f32
    %18 = vector.broadcast %cst_13 : f32 to vector<16x32xf32>
    %19 = arith.addf %18, %17 : vector<16x32xf32>
    %20 = arith.divf %18, %19 : vector<16x32xf32>
    %21 = arith.mulf %3, %20 : vector<16x32xf32>
    %cst_14 = arith.constant 1.000000e+00 : f32
    %22 = vector.broadcast %cst_14 : f32 to vector<1x32xf32>
    %cst_15 = arith.constant dense<0.000000e+00> : vector<1x16xf32>
    %23 = tpu.matmul %22, %21, %cst_15 {dimension_numbers = #tpu.dot_dimension_numbers<[1], [1], [0], [0], [0, 0, 1, 0], [], []>} : vector<1x32xf32>, vector<16x32xf32>, vector<1x16xf32> -> vector<1x16xf32>
    %cst_16 = arith.constant 3.125000e-02 : f32
    %24 = vector.broadcast %cst_16 : f32 to vector<1x16xf32>
    %25 = arith.mulf %23, %24 : vector<1x16xf32>
    %c0_17 = arith.constant 0 : index
    %c0_18 = arith.constant 0 : index
    %26 = vector.load %arg7[%c0_17, %c0_18] : memref<1x16xf32, #tpu.memory_space<vmem>>, vector<1x16xf32>
    tpu.vector_store %arg7[%c0_17, %c0_18], %25 {strides = array<i32>} : memref<1x16xf32, #tpu.memory_space<vmem>>, vector<1x16xf32>,
    return
  }
  func.func @transform_0(%arg0: i32) -> (i32, i32) {
    %c0_i32 = arith.constant 0 : i32
    %c0_i32_0 = arith.constant 0 : i32
    return %arg0, %c0_i32 : i32, i32
  }
  func.func @transform_1(%arg0: i32) -> (i32, i32) {
    %c0_i32 = arith.constant 0 : i32
    %c0_i32_0 = arith.constant 0 : i32
    return %arg0, %c0_i32 : i32, i32
  }
  func.func @transform_2(%arg0: i32) -> (i32, i32) {
    %c0_i32 = arith.constant 0 : i32
    %c0_i32_0 = arith.constant 0 : i32
    %c0_i32_1 = arith.constant 0 : i32
    return %c0_i32, %c0_i32_0 : i32, i32
  }
  func.func @transform_3(%arg0: i32) -> (i32, i32) {
    %c0_i32 = arith.constant 0 : i32
    %c0_i32_0 = arith.constant 0 : i32
    %c0_i32_1 = arith.constant 0 : i32
    return %c0_i32, %c0_i32_0 : i32, i32
  }
  func.func @transform_4(%arg0: i32) -> (i32, i32) {
    %c0_i32 = arith.constant 0 : i32
    %c0_i32_0 = arith.constant 0 : i32
    %c0_i32_1 = arith.constant 0 : i32
    return %c0_i32, %c0_i32_0 : i32, i32
  }
  func.func @transform_5(%arg0: i32) -> (i32, i32) {
    %c0_i32 = arith.constant 0 : i32
    %c0_i32_0 = arith.constant 0 : i32
    %c0_i32_1 = arith.constant 0 : i32
    return %c0_i32, %c0_i32_0 : i32, i32
  }
  func.func @transform_6(%arg0: i32) -> (i32, i32) {
    %c0_i32 = arith.constant 0 : i32
    %c0_i32_0 = arith.constant 0 : i32
    return %arg0, %c0_i32 : i32, i32
  }
}

module attributes {stable_mosaic.version = 11 : i64} {
  func.func @lstm_score_kernel(%arg0: i32, %arg1: memref<2x8xf32, #tpu.memory_space<vmem>>, %arg2: memref<32x1xf32, #tpu.memory_space<vmem>>, %arg3: memref<32x8xf32, #tpu.memory_space<vmem>>, %arg4: memref<32x1xf32, #tpu.memory_space<vmem>>, %arg5: memref<8x1xf32, #tpu.memory_space<vmem>>, %arg6: memref<1x1xf32, #tpu.memory_space<vmem>>, %arg7: memref<2x8xf32, #tpu.memory_space<vmem>>, %arg8: memref<8x32x2xf32, #tpu.memory_space<vmem>>, %arg9: memref<8x2xf32, #tpu.memory_space<vmem>>) attributes {dimension_semantics = [#tpu.dimension_semantics<parallel>], iteration_bounds = array<i64: 1>, scalar_prefetch = 0 : i64, scratch_operands = 2 : i64, tpu.core_type = #tpu.core_type<tc>, window_params = [{transform_indices = @transform_0, window_bounds = array<i64: 2, 8>}, {pipeline_mode = #tpu.pipeline_mode<synchronous>, transform_indices = @transform_1, window_bounds = array<i64: 32, 1>}, {pipeline_mode = #tpu.pipeline_mode<synchronous>, transform_indices = @transform_2, window_bounds = array<i64: 32, 8>}, {pipeline_mode = #tpu.pipeline_mode<synchronous>, transform_indices = @transform_3, window_bounds = array<i64: 32, 1>}, {pipeline_mode = #tpu.pipeline_mode<synchronous>, transform_indices = @transform_4, window_bounds = array<i64: 8, 1>}, {pipeline_mode = #tpu.pipeline_mode<synchronous>, transform_indices = @transform_5, window_bounds = array<i64: 1, 1>}, {transform_indices = @transform_6, window_bounds = array<i64: 2, 8>}]} {
    %c0 = arith.constant 0 : index
    %c0_0 = arith.constant 0 : index
    %0 = vector.load %arg2[%c0, %c0_0] : memref<32x1xf32, #tpu.memory_space<vmem>>, vector<32x1xf32>
    %c0_1 = arith.constant 0 : index
    %c0_2 = arith.constant 0 : index
    %1 = vector.load %arg3[%c0_1, %c0_2] : memref<32x8xf32, #tpu.memory_space<vmem>>, vector<32x8xf32>
    %c0_3 = arith.constant 0 : index
    %c0_4 = arith.constant 0 : index
    %2 = vector.load %arg4[%c0_3, %c0_4] : memref<32x1xf32, #tpu.memory_space<vmem>>, vector<32x1xf32>
    %c0_5 = arith.constant 0 : index
    %c0_6 = arith.constant 0 : index
    %3 = vector.load %arg5[%c0_5, %c0_6] : memref<8x1xf32, #tpu.memory_space<vmem>>, vector<8x1xf32>
    %c0_7 = arith.constant 0 : index
    %c0_8 = arith.constant 0 : index
    %4 = vector.load %arg1[%c0_7, %c0_8] : memref<2x8xf32, #tpu.memory_space<vmem>>, vector<2x8xf32>
    %5 = tpu.iota {dimensions = array<i32: 0>} : vector<8x8xi32>
    %6 = tpu.iota {dimensions = array<i32: 1>} : vector<8x8xi32>
    %7 = arith.cmpi eq, %5, %6 : vector<8x8xi32>
    %cst = arith.constant 1.000000e+00 : f32
    %cst_9 = arith.constant 0.000000e+00 : f32
    %8 = vector.broadcast %cst : f32 to vector<8x8xf32>
    %9 = vector.broadcast %cst_9 : f32 to vector<8x8xf32>
    %10 = arith.select %7, %8, %9 : vector<8x8xi1>, vector<8x8xf32>
    %cst_10 = arith.constant dense<0.000000e+00> : vector<8x2xf32>
    %11 = tpu.matmul %10, %4, %cst_10 {dimension_numbers = #tpu.dot_dimension_numbers<[1], [1], [0], [0], [0, 0, 1, 0], [], []>} : vector<8x8xf32>, vector<2x8xf32>, vector<8x2xf32> -> vector<8x2xf32>
    %12 = vector.shape_cast %0 : vector<32x1xf32> to vector<1x32x1xf32>
    %13 = vector.shape_cast %11 : vector<8x2xf32> to vector<8x1x2xf32>
    %14 = vector.broadcast %12 : vector<1x32x1xf32> to vector<8x32x2xf32>
    %15 = vector.broadcast %13 : vector<8x1x2xf32> to vector<8x32x2xf32>
    %16 = arith.mulf %14, %15 : vector<8x32x2xf32>
    %17 = vector.shape_cast %2 : vector<32x1xf32> to vector<1x32x1xf32>
    %18 = vector.broadcast %17 : vector<1x32x1xf32> to vector<8x32x2xf32>
    %19 = arith.addf %16, %18 : vector<8x32x2xf32>
    %c0_11 = arith.constant 0 : index
    %c0_12 = arith.constant 0 : index
    %c0_13 = arith.constant 0 : index
    %20 = vector.load %arg8[%c0_11, %c0_12, %c0_13] : memref<8x32x2xf32, #tpu.memory_space<vmem>>, vector<8x32x2xf32>
    tpu.vector_store %arg8[%c0_11, %c0_12, %c0_13], %19 {strides = array<i32>} : memref<8x32x2xf32, #tpu.memory_space<vmem>>, vector<8x32x2xf32>,
    %cst_14 = arith.constant 0.000000e+00 : f32
    %21 = vector.broadcast %cst_14 : f32 to vector<8x2xf32>
    %c0_i32 = arith.constant 0 : i32
    %cst_15 = arith.constant dense<0.000000e+00> : vector<32x2xf32>
    %22 = tpu.matmul %1, %21, %cst_15 {dimension_numbers = #tpu.dot_dimension_numbers<[1], [0], [0], [1], [0, 0, 1, 1], [], []>} : vector<32x8xf32>, vector<8x2xf32>, vector<32x2xf32> -> vector<32x2xf32>
    %23 = arith.index_cast %c0_i32 : i32 to index
    %c0_16 = arith.constant 0 : index
    %c0_17 = arith.constant 0 : index
    %24 = vector.load %arg8[%23, %c0_16, %c0_17] : memref<8x32x2xf32, #tpu.memory_space<vmem>>, vector<1x32x2xf32>
    %25 = vector.shape_cast %24 : vector<1x32x2xf32> to vector<32x2xf32>
    %26 = arith.addf %25, %22 : vector<32x2xf32>
    %27 = vector.extract_strided_slice %26 {offsets = [0, 0], sizes = [24, 2], strides = [1, 1]} : vector<32x2xf32> to vector<24x2xf32>
    %28 = arith.negf %27 : vector<24x2xf32>
    %29 = math.exp %28 : vector<24x2xf32>
    %cst_18 = arith.constant 1.000000e+00 : f32
    %30 = vector.broadcast %cst_18 : f32 to vector<24x2xf32>
    %31 = arith.addf %30, %29 : vector<24x2xf32>
    %32 = arith.divf %30, %31 : vector<24x2xf32>
    %33 = vector.extract_strided_slice %32 {offsets = [0, 0], sizes = [8, 2], strides = [1, 1]} : vector<24x2xf32> to vector<8x2xf32>
    %34 = vector.extract_strided_slice %32 {offsets = [8, 0], sizes = [8, 2], strides = [1, 1]} : vector<24x2xf32> to vector<8x2xf32>
    %35 = vector.extract_strided_slice %32 {offsets = [16, 0], sizes = [8, 2], strides = [1, 1]} : vector<24x2xf32> to vector<8x2xf32>
    %36 = vector.extract_strided_slice %26 {offsets = [24, 0], sizes = [8, 2], strides = [1, 1]} : vector<32x2xf32> to vector<8x2xf32>
    %37 = math.tanh %36 : vector<8x2xf32>
    %38 = arith.mulf %34, %21 : vector<8x2xf32>
    %39 = arith.mulf %33, %37 : vector<8x2xf32>
    %40 = arith.addf %38, %39 : vector<8x2xf32>
    %41 = math.tanh %40 : vector<8x2xf32>
    %42 = arith.mulf %35, %41 : vector<8x2xf32>
    %43 = vector.broadcast %3 : vector<8x1xf32> to vector<8x2xf32>
    %44 = arith.mulf %43, %42 : vector<8x2xf32>
    %cst_19 = arith.constant dense<0.000000e+00> : vector<2xf32>
    %45 = vector.multi_reduction <add>, %44, %cst_19 [0] : vector<8x2xf32> to vector<2xf32>
    %46 = vector.shape_cast %45 : vector<2xf32> to vector<1x2xf32>
    %47 = arith.index_cast %c0_i32 : i32 to index
    %c0_20 = arith.constant 0 : index
    %48 = vector.load %arg9[%47, %c0_20] : memref<8x2xf32, #tpu.memory_space<vmem>>, vector<1x2xf32>
    tpu.vector_store %arg9[%47, %c0_20], %46 {strides = array<i32>} : memref<8x2xf32, #tpu.memory_space<vmem>>, vector<1x2xf32>,
    %c1_i32 = arith.constant 1 : i32
    %cst_21 = arith.constant dense<0.000000e+00> : vector<32x2xf32>
    %49 = tpu.matmul %1, %42, %cst_21 {dimension_numbers = #tpu.dot_dimension_numbers<[1], [0], [0], [1], [0, 0, 1, 1], [], []>} : vector<32x8xf32>, vector<8x2xf32>, vector<32x2xf32> -> vector<32x2xf32>
    %50 = arith.index_cast %c1_i32 : i32 to index
    %c0_22 = arith.constant 0 : index
    %c0_23 = arith.constant 0 : index
    %51 = vector.load %arg8[%50, %c0_22, %c0_23] : memref<8x32x2xf32, #tpu.memory_space<vmem>>, vector<1x32x2xf32>
    %52 = vector.shape_cast %51 : vector<1x32x2xf32> to vector<32x2xf32>
    %53 = arith.addf %52, %49 : vector<32x2xf32>
    %54 = vector.extract_strided_slice %53 {offsets = [0, 0], sizes = [24, 2], strides = [1, 1]} : vector<32x2xf32> to vector<24x2xf32>
    %55 = arith.negf %54 : vector<24x2xf32>
    %56 = math.exp %55 : vector<24x2xf32>
    %cst_24 = arith.constant 1.000000e+00 : f32
    %57 = vector.broadcast %cst_24 : f32 to vector<24x2xf32>
    %58 = arith.addf %57, %56 : vector<24x2xf32>
    %59 = arith.divf %57, %58 : vector<24x2xf32>
    %60 = vector.extract_strided_slice %59 {offsets = [0, 0], sizes = [8, 2], strides = [1, 1]} : vector<24x2xf32> to vector<8x2xf32>
    %61 = vector.extract_strided_slice %59 {offsets = [8, 0], sizes = [8, 2], strides = [1, 1]} : vector<24x2xf32> to vector<8x2xf32>
    %62 = vector.extract_strided_slice %59 {offsets = [16, 0], sizes = [8, 2], strides = [1, 1]} : vector<24x2xf32> to vector<8x2xf32>
    %63 = vector.extract_strided_slice %53 {offsets = [24, 0], sizes = [8, 2], strides = [1, 1]} : vector<32x2xf32> to vector<8x2xf32>
    %64 = math.tanh %63 : vector<8x2xf32>
    %65 = arith.mulf %61, %40 : vector<8x2xf32>
    %66 = arith.mulf %60, %64 : vector<8x2xf32>
    %67 = arith.addf %65, %66 : vector<8x2xf32>
    %68 = math.tanh %67 : vector<8x2xf32>
    %69 = arith.mulf %62, %68 : vector<8x2xf32>
    %70 = vector.broadcast %3 : vector<8x1xf32> to vector<8x2xf32>
    %71 = arith.mulf %70, %69 : vector<8x2xf32>
    %cst_25 = arith.constant dense<0.000000e+00> : vector<2xf32>
    %72 = vector.multi_reduction <add>, %71, %cst_25 [0] : vector<8x2xf32> to vector<2xf32>
    %73 = vector.shape_cast %72 : vector<2xf32> to vector<1x2xf32>
    %74 = arith.index_cast %c1_i32 : i32 to index
    %c0_26 = arith.constant 0 : index
    %75 = vector.load %arg9[%74, %c0_26] : memref<8x2xf32, #tpu.memory_space<vmem>>, vector<1x2xf32>
    tpu.vector_store %arg9[%74, %c0_26], %73 {strides = array<i32>} : memref<8x2xf32, #tpu.memory_space<vmem>>, vector<1x2xf32>,
    %c2_i32 = arith.constant 2 : i32
    %cst_27 = arith.constant dense<0.000000e+00> : vector<32x2xf32>
    %76 = tpu.matmul %1, %69, %cst_27 {dimension_numbers = #tpu.dot_dimension_numbers<[1], [0], [0], [1], [0, 0, 1, 1], [], []>} : vector<32x8xf32>, vector<8x2xf32>, vector<32x2xf32> -> vector<32x2xf32>
    %77 = arith.index_cast %c2_i32 : i32 to index
    %c0_28 = arith.constant 0 : index
    %c0_29 = arith.constant 0 : index
    %78 = vector.load %arg8[%77, %c0_28, %c0_29] : memref<8x32x2xf32, #tpu.memory_space<vmem>>, vector<1x32x2xf32>
    %79 = vector.shape_cast %78 : vector<1x32x2xf32> to vector<32x2xf32>
    %80 = arith.addf %79, %76 : vector<32x2xf32>
    %81 = vector.extract_strided_slice %80 {offsets = [0, 0], sizes = [24, 2], strides = [1, 1]} : vector<32x2xf32> to vector<24x2xf32>
    %82 = arith.negf %81 : vector<24x2xf32>
    %83 = math.exp %82 : vector<24x2xf32>
    %cst_30 = arith.constant 1.000000e+00 : f32
    %84 = vector.broadcast %cst_30 : f32 to vector<24x2xf32>
    %85 = arith.addf %84, %83 : vector<24x2xf32>
    %86 = arith.divf %84, %85 : vector<24x2xf32>
    %87 = vector.extract_strided_slice %86 {offsets = [0, 0], sizes = [8, 2], strides = [1, 1]} : vector<24x2xf32> to vector<8x2xf32>
    %88 = vector.extract_strided_slice %86 {offsets = [8, 0], sizes = [8, 2], strides = [1, 1]} : vector<24x2xf32> to vector<8x2xf32>
    %89 = vector.extract_strided_slice %86 {offsets = [16, 0], sizes = [8, 2], strides = [1, 1]} : vector<24x2xf32> to vector<8x2xf32>
    %90 = vector.extract_strided_slice %80 {offsets = [24, 0], sizes = [8, 2], strides = [1, 1]} : vector<32x2xf32> to vector<8x2xf32>
    %91 = math.tanh %90 : vector<8x2xf32>
    %92 = arith.mulf %88, %67 : vector<8x2xf32>
    %93 = arith.mulf %87, %91 : vector<8x2xf32>
    %94 = arith.addf %92, %93 : vector<8x2xf32>
    %95 = math.tanh %94 : vector<8x2xf32>
    %96 = arith.mulf %89, %95 : vector<8x2xf32>
    %97 = vector.broadcast %3 : vector<8x1xf32> to vector<8x2xf32>
    %98 = arith.mulf %97, %96 : vector<8x2xf32>
    %cst_31 = arith.constant dense<0.000000e+00> : vector<2xf32>
    %99 = vector.multi_reduction <add>, %98, %cst_31 [0] : vector<8x2xf32> to vector<2xf32>
    %100 = vector.shape_cast %99 : vector<2xf32> to vector<1x2xf32>
    %101 = arith.index_cast %c2_i32 : i32 to index
    %c0_32 = arith.constant 0 : index
    %102 = vector.load %arg9[%101, %c0_32] : memref<8x2xf32, #tpu.memory_space<vmem>>, vector<1x2xf32>
    tpu.vector_store %arg9[%101, %c0_32], %100 {strides = array<i32>} : memref<8x2xf32, #tpu.memory_space<vmem>>, vector<1x2xf32>,
    %c3_i32 = arith.constant 3 : i32
    %cst_33 = arith.constant dense<0.000000e+00> : vector<32x2xf32>
    %103 = tpu.matmul %1, %96, %cst_33 {dimension_numbers = #tpu.dot_dimension_numbers<[1], [0], [0], [1], [0, 0, 1, 1], [], []>} : vector<32x8xf32>, vector<8x2xf32>, vector<32x2xf32> -> vector<32x2xf32>
    %104 = arith.index_cast %c3_i32 : i32 to index
    %c0_34 = arith.constant 0 : index
    %c0_35 = arith.constant 0 : index
    %105 = vector.load %arg8[%104, %c0_34, %c0_35] : memref<8x32x2xf32, #tpu.memory_space<vmem>>, vector<1x32x2xf32>
    %106 = vector.shape_cast %105 : vector<1x32x2xf32> to vector<32x2xf32>
    %107 = arith.addf %106, %103 : vector<32x2xf32>
    %108 = vector.extract_strided_slice %107 {offsets = [0, 0], sizes = [24, 2], strides = [1, 1]} : vector<32x2xf32> to vector<24x2xf32>
    %109 = arith.negf %108 : vector<24x2xf32>
    %110 = math.exp %109 : vector<24x2xf32>
    %cst_36 = arith.constant 1.000000e+00 : f32
    %111 = vector.broadcast %cst_36 : f32 to vector<24x2xf32>
    %112 = arith.addf %111, %110 : vector<24x2xf32>
    %113 = arith.divf %111, %112 : vector<24x2xf32>
    %114 = vector.extract_strided_slice %113 {offsets = [0, 0], sizes = [8, 2], strides = [1, 1]} : vector<24x2xf32> to vector<8x2xf32>
    %115 = vector.extract_strided_slice %113 {offsets = [8, 0], sizes = [8, 2], strides = [1, 1]} : vector<24x2xf32> to vector<8x2xf32>
    %116 = vector.extract_strided_slice %113 {offsets = [16, 0], sizes = [8, 2], strides = [1, 1]} : vector<24x2xf32> to vector<8x2xf32>
    %117 = vector.extract_strided_slice %107 {offsets = [24, 0], sizes = [8, 2], strides = [1, 1]} : vector<32x2xf32> to vector<8x2xf32>
    %118 = math.tanh %117 : vector<8x2xf32>
    %119 = arith.mulf %115, %94 : vector<8x2xf32>
    %120 = arith.mulf %114, %118 : vector<8x2xf32>
    %121 = arith.addf %119, %120 : vector<8x2xf32>
    %122 = math.tanh %121 : vector<8x2xf32>
    %123 = arith.mulf %116, %122 : vector<8x2xf32>
    %124 = vector.broadcast %3 : vector<8x1xf32> to vector<8x2xf32>
    %125 = arith.mulf %124, %123 : vector<8x2xf32>
    %cst_37 = arith.constant dense<0.000000e+00> : vector<2xf32>
    %126 = vector.multi_reduction <add>, %125, %cst_37 [0] : vector<8x2xf32> to vector<2xf32>
    %127 = vector.shape_cast %126 : vector<2xf32> to vector<1x2xf32>
    %128 = arith.index_cast %c3_i32 : i32 to index
    %c0_38 = arith.constant 0 : index
    %129 = vector.load %arg9[%128, %c0_38] : memref<8x2xf32, #tpu.memory_space<vmem>>, vector<1x2xf32>
    tpu.vector_store %arg9[%128, %c0_38], %127 {strides = array<i32>} : memref<8x2xf32, #tpu.memory_space<vmem>>, vector<1x2xf32>,
    %c4_i32 = arith.constant 4 : i32
    %cst_39 = arith.constant dense<0.000000e+00> : vector<32x2xf32>
    %130 = tpu.matmul %1, %123, %cst_39 {dimension_numbers = #tpu.dot_dimension_numbers<[1], [0], [0], [1], [0, 0, 1, 1], [], []>} : vector<32x8xf32>, vector<8x2xf32>, vector<32x2xf32> -> vector<32x2xf32>
    %131 = arith.index_cast %c4_i32 : i32 to index
    %c0_40 = arith.constant 0 : index
    %c0_41 = arith.constant 0 : index
    %132 = vector.load %arg8[%131, %c0_40, %c0_41] : memref<8x32x2xf32, #tpu.memory_space<vmem>>, vector<1x32x2xf32>
    %133 = vector.shape_cast %132 : vector<1x32x2xf32> to vector<32x2xf32>
    %134 = arith.addf %133, %130 : vector<32x2xf32>
    %135 = vector.extract_strided_slice %134 {offsets = [0, 0], sizes = [24, 2], strides = [1, 1]} : vector<32x2xf32> to vector<24x2xf32>
    %136 = arith.negf %135 : vector<24x2xf32>
    %137 = math.exp %136 : vector<24x2xf32>
    %cst_42 = arith.constant 1.000000e+00 : f32
    %138 = vector.broadcast %cst_42 : f32 to vector<24x2xf32>
    %139 = arith.addf %138, %137 : vector<24x2xf32>
    %140 = arith.divf %138, %139 : vector<24x2xf32>
    %141 = vector.extract_strided_slice %140 {offsets = [0, 0], sizes = [8, 2], strides = [1, 1]} : vector<24x2xf32> to vector<8x2xf32>
    %142 = vector.extract_strided_slice %140 {offsets = [8, 0], sizes = [8, 2], strides = [1, 1]} : vector<24x2xf32> to vector<8x2xf32>
    %143 = vector.extract_strided_slice %140 {offsets = [16, 0], sizes = [8, 2], strides = [1, 1]} : vector<24x2xf32> to vector<8x2xf32>
    %144 = vector.extract_strided_slice %134 {offsets = [24, 0], sizes = [8, 2], strides = [1, 1]} : vector<32x2xf32> to vector<8x2xf32>
    %145 = math.tanh %144 : vector<8x2xf32>
    %146 = arith.mulf %142, %121 : vector<8x2xf32>
    %147 = arith.mulf %141, %145 : vector<8x2xf32>
    %148 = arith.addf %146, %147 : vector<8x2xf32>
    %149 = math.tanh %148 : vector<8x2xf32>
    %150 = arith.mulf %143, %149 : vector<8x2xf32>
    %151 = vector.broadcast %3 : vector<8x1xf32> to vector<8x2xf32>
    %152 = arith.mulf %151, %150 : vector<8x2xf32>
    %cst_43 = arith.constant dense<0.000000e+00> : vector<2xf32>
    %153 = vector.multi_reduction <add>, %152, %cst_43 [0] : vector<8x2xf32> to vector<2xf32>
    %154 = vector.shape_cast %153 : vector<2xf32> to vector<1x2xf32>
    %155 = arith.index_cast %c4_i32 : i32 to index
    %c0_44 = arith.constant 0 : index
    %156 = vector.load %arg9[%155, %c0_44] : memref<8x2xf32, #tpu.memory_space<vmem>>, vector<1x2xf32>
    tpu.vector_store %arg9[%155, %c0_44], %154 {strides = array<i32>} : memref<8x2xf32, #tpu.memory_space<vmem>>, vector<1x2xf32>,
    %c5_i32 = arith.constant 5 : i32
    %cst_45 = arith.constant dense<0.000000e+00> : vector<32x2xf32>
    %157 = tpu.matmul %1, %150, %cst_45 {dimension_numbers = #tpu.dot_dimension_numbers<[1], [0], [0], [1], [0, 0, 1, 1], [], []>} : vector<32x8xf32>, vector<8x2xf32>, vector<32x2xf32> -> vector<32x2xf32>
    %158 = arith.index_cast %c5_i32 : i32 to index
    %c0_46 = arith.constant 0 : index
    %c0_47 = arith.constant 0 : index
    %159 = vector.load %arg8[%158, %c0_46, %c0_47] : memref<8x32x2xf32, #tpu.memory_space<vmem>>, vector<1x32x2xf32>
    %160 = vector.shape_cast %159 : vector<1x32x2xf32> to vector<32x2xf32>
    %161 = arith.addf %160, %157 : vector<32x2xf32>
    %162 = vector.extract_strided_slice %161 {offsets = [0, 0], sizes = [24, 2], strides = [1, 1]} : vector<32x2xf32> to vector<24x2xf32>
    %163 = arith.negf %162 : vector<24x2xf32>
    %164 = math.exp %163 : vector<24x2xf32>
    %cst_48 = arith.constant 1.000000e+00 : f32
    %165 = vector.broadcast %cst_48 : f32 to vector<24x2xf32>
    %166 = arith.addf %165, %164 : vector<24x2xf32>
    %167 = arith.divf %165, %166 : vector<24x2xf32>
    %168 = vector.extract_strided_slice %167 {offsets = [0, 0], sizes = [8, 2], strides = [1, 1]} : vector<24x2xf32> to vector<8x2xf32>
    %169 = vector.extract_strided_slice %167 {offsets = [8, 0], sizes = [8, 2], strides = [1, 1]} : vector<24x2xf32> to vector<8x2xf32>
    %170 = vector.extract_strided_slice %167 {offsets = [16, 0], sizes = [8, 2], strides = [1, 1]} : vector<24x2xf32> to vector<8x2xf32>
    %171 = vector.extract_strided_slice %161 {offsets = [24, 0], sizes = [8, 2], strides = [1, 1]} : vector<32x2xf32> to vector<8x2xf32>
    %172 = math.tanh %171 : vector<8x2xf32>
    %173 = arith.mulf %169, %148 : vector<8x2xf32>
    %174 = arith.mulf %168, %172 : vector<8x2xf32>
    %175 = arith.addf %173, %174 : vector<8x2xf32>
    %176 = math.tanh %175 : vector<8x2xf32>
    %177 = arith.mulf %170, %176 : vector<8x2xf32>
    %178 = vector.broadcast %3 : vector<8x1xf32> to vector<8x2xf32>
    %179 = arith.mulf %178, %177 : vector<8x2xf32>
    %cst_49 = arith.constant dense<0.000000e+00> : vector<2xf32>
    %180 = vector.multi_reduction <add>, %179, %cst_49 [0] : vector<8x2xf32> to vector<2xf32>
    %181 = vector.shape_cast %180 : vector<2xf32> to vector<1x2xf32>
    %182 = arith.index_cast %c5_i32 : i32 to index
    %c0_50 = arith.constant 0 : index
    %183 = vector.load %arg9[%182, %c0_50] : memref<8x2xf32, #tpu.memory_space<vmem>>, vector<1x2xf32>
    tpu.vector_store %arg9[%182, %c0_50], %181 {strides = array<i32>} : memref<8x2xf32, #tpu.memory_space<vmem>>, vector<1x2xf32>,
    %c6_i32 = arith.constant 6 : i32
    %cst_51 = arith.constant dense<0.000000e+00> : vector<32x2xf32>
    %184 = tpu.matmul %1, %177, %cst_51 {dimension_numbers = #tpu.dot_dimension_numbers<[1], [0], [0], [1], [0, 0, 1, 1], [], []>} : vector<32x8xf32>, vector<8x2xf32>, vector<32x2xf32> -> vector<32x2xf32>
    %185 = arith.index_cast %c6_i32 : i32 to index
    %c0_52 = arith.constant 0 : index
    %c0_53 = arith.constant 0 : index
    %186 = vector.load %arg8[%185, %c0_52, %c0_53] : memref<8x32x2xf32, #tpu.memory_space<vmem>>, vector<1x32x2xf32>
    %187 = vector.shape_cast %186 : vector<1x32x2xf32> to vector<32x2xf32>
    %188 = arith.addf %187, %184 : vector<32x2xf32>
    %189 = vector.extract_strided_slice %188 {offsets = [0, 0], sizes = [24, 2], strides = [1, 1]} : vector<32x2xf32> to vector<24x2xf32>
    %190 = arith.negf %189 : vector<24x2xf32>
    %191 = math.exp %190 : vector<24x2xf32>
    %cst_54 = arith.constant 1.000000e+00 : f32
    %192 = vector.broadcast %cst_54 : f32 to vector<24x2xf32>
    %193 = arith.addf %192, %191 : vector<24x2xf32>
    %194 = arith.divf %192, %193 : vector<24x2xf32>
    %195 = vector.extract_strided_slice %194 {offsets = [0, 0], sizes = [8, 2], strides = [1, 1]} : vector<24x2xf32> to vector<8x2xf32>
    %196 = vector.extract_strided_slice %194 {offsets = [8, 0], sizes = [8, 2], strides = [1, 1]} : vector<24x2xf32> to vector<8x2xf32>
    %197 = vector.extract_strided_slice %194 {offsets = [16, 0], sizes = [8, 2], strides = [1, 1]} : vector<24x2xf32> to vector<8x2xf32>
    %198 = vector.extract_strided_slice %188 {offsets = [24, 0], sizes = [8, 2], strides = [1, 1]} : vector<32x2xf32> to vector<8x2xf32>
    %199 = math.tanh %198 : vector<8x2xf32>
    %200 = arith.mulf %196, %175 : vector<8x2xf32>
    %201 = arith.mulf %195, %199 : vector<8x2xf32>
    %202 = arith.addf %200, %201 : vector<8x2xf32>
    %203 = math.tanh %202 : vector<8x2xf32>
    %204 = arith.mulf %197, %203 : vector<8x2xf32>
    %205 = vector.broadcast %3 : vector<8x1xf32> to vector<8x2xf32>
    %206 = arith.mulf %205, %204 : vector<8x2xf32>
    %cst_55 = arith.constant dense<0.000000e+00> : vector<2xf32>
    %207 = vector.multi_reduction <add>, %206, %cst_55 [0] : vector<8x2xf32> to vector<2xf32>
    %208 = vector.shape_cast %207 : vector<2xf32> to vector<1x2xf32>
    %209 = arith.index_cast %c6_i32 : i32 to index
    %c0_56 = arith.constant 0 : index
    %210 = vector.load %arg9[%209, %c0_56] : memref<8x2xf32, #tpu.memory_space<vmem>>, vector<1x2xf32>
    tpu.vector_store %arg9[%209, %c0_56], %208 {strides = array<i32>} : memref<8x2xf32, #tpu.memory_space<vmem>>, vector<1x2xf32>,
    %c7_i32 = arith.constant 7 : i32
    %cst_57 = arith.constant dense<0.000000e+00> : vector<32x2xf32>
    %211 = tpu.matmul %1, %204, %cst_57 {dimension_numbers = #tpu.dot_dimension_numbers<[1], [0], [0], [1], [0, 0, 1, 1], [], []>} : vector<32x8xf32>, vector<8x2xf32>, vector<32x2xf32> -> vector<32x2xf32>
    %212 = arith.index_cast %c7_i32 : i32 to index
    %c0_58 = arith.constant 0 : index
    %c0_59 = arith.constant 0 : index
    %213 = vector.load %arg8[%212, %c0_58, %c0_59] : memref<8x32x2xf32, #tpu.memory_space<vmem>>, vector<1x32x2xf32>
    %214 = vector.shape_cast %213 : vector<1x32x2xf32> to vector<32x2xf32>
    %215 = arith.addf %214, %211 : vector<32x2xf32>
    %216 = vector.extract_strided_slice %215 {offsets = [0, 0], sizes = [24, 2], strides = [1, 1]} : vector<32x2xf32> to vector<24x2xf32>
    %217 = arith.negf %216 : vector<24x2xf32>
    %218 = math.exp %217 : vector<24x2xf32>
    %cst_60 = arith.constant 1.000000e+00 : f32
    %219 = vector.broadcast %cst_60 : f32 to vector<24x2xf32>
    %220 = arith.addf %219, %218 : vector<24x2xf32>
    %221 = arith.divf %219, %220 : vector<24x2xf32>
    %222 = vector.extract_strided_slice %221 {offsets = [0, 0], sizes = [8, 2], strides = [1, 1]} : vector<24x2xf32> to vector<8x2xf32>
    %223 = vector.extract_strided_slice %221 {offsets = [8, 0], sizes = [8, 2], strides = [1, 1]} : vector<24x2xf32> to vector<8x2xf32>
    %224 = vector.extract_strided_slice %221 {offsets = [16, 0], sizes = [8, 2], strides = [1, 1]} : vector<24x2xf32> to vector<8x2xf32>
    %225 = vector.extract_strided_slice %215 {offsets = [24, 0], sizes = [8, 2], strides = [1, 1]} : vector<32x2xf32> to vector<8x2xf32>
    %226 = math.tanh %225 : vector<8x2xf32>
    %227 = arith.mulf %223, %202 : vector<8x2xf32>
    %228 = arith.mulf %222, %226 : vector<8x2xf32>
    %229 = arith.addf %227, %228 : vector<8x2xf32>
    %230 = math.tanh %229 : vector<8x2xf32>
    %231 = arith.mulf %224, %230 : vector<8x2xf32>
    %232 = vector.broadcast %3 : vector<8x1xf32> to vector<8x2xf32>
    %233 = arith.mulf %232, %231 : vector<8x2xf32>
    %cst_61 = arith.constant dense<0.000000e+00> : vector<2xf32>
    %234 = vector.multi_reduction <add>, %233, %cst_61 [0] : vector<8x2xf32> to vector<2xf32>
    %235 = vector.shape_cast %234 : vector<2xf32> to vector<1x2xf32>
    %236 = arith.index_cast %c7_i32 : i32 to index
    %c0_62 = arith.constant 0 : index
    %237 = vector.load %arg9[%236, %c0_62] : memref<8x2xf32, #tpu.memory_space<vmem>>, vector<1x2xf32>
    tpu.vector_store %arg9[%236, %c0_62], %235 {strides = array<i32>} : memref<8x2xf32, #tpu.memory_space<vmem>>, vector<1x2xf32>,
    %c8_i32 = arith.constant 8 : i32
    %c0_63 = arith.constant 0 : index
    %c0_64 = arith.constant 0 : index
    %238 = vector.load %arg9[%c0_63, %c0_64] : memref<8x2xf32, #tpu.memory_space<vmem>>, vector<8x2xf32>
    %239 = tpu.iota {dimensions = array<i32: 0>} : vector<2x2xi32>
    %240 = tpu.iota {dimensions = array<i32: 1>} : vector<2x2xi32>
    %241 = arith.cmpi eq, %239, %240 : vector<2x2xi32>
    %cst_65 = arith.constant 1.000000e+00 : f32
    %cst_66 = arith.constant 0.000000e+00 : f32
    %242 = vector.broadcast %cst_65 : f32 to vector<2x2xf32>
    %243 = vector.broadcast %cst_66 : f32 to vector<2x2xf32>
    %244 = arith.select %241, %242, %243 : vector<2x2xi1>, vector<2x2xf32>
    %cst_67 = arith.constant dense<0.000000e+00> : vector<2x8xf32>
    %245 = tpu.matmul %244, %238, %cst_67 {dimension_numbers = #tpu.dot_dimension_numbers<[1], [1], [0], [0], [0, 0, 1, 0], [], []>} : vector<2x2xf32>, vector<8x2xf32>, vector<2x8xf32> -> vector<2x8xf32>
    %c0_68 = arith.constant 0 : index
    %c0_69 = arith.constant 0 : index
    %246 = vector.load %arg1[%c0_68, %c0_69] : memref<2x8xf32, #tpu.memory_space<vmem>>, vector<2x8xf32>
    %247 = arith.addf %246, %245 : vector<2x8xf32>
    %c0_70 = arith.constant 0 : index
    %c0_71 = arith.constant 0 : index
    %248 = vector.load %arg6[%c0_70, %c0_71] : memref<1x1xf32, #tpu.memory_space<vmem>>, vector<1x1xf32>
    %249 = vector.broadcast %248 : vector<1x1xf32> to vector<2x8xf32>
    %250 = arith.addf %247, %249 : vector<2x8xf32>
    %251 = arith.negf %250 : vector<2x8xf32>
    %252 = math.exp %251 : vector<2x8xf32>
    %cst_72 = arith.constant 1.000000e+00 : f32
    %253 = vector.broadcast %cst_72 : f32 to vector<2x8xf32>
    %254 = arith.addf %253, %252 : vector<2x8xf32>
    %255 = arith.divf %253, %254 : vector<2x8xf32>
    %c0_73 = arith.constant 0 : index
    %c0_74 = arith.constant 0 : index
    %256 = vector.load %arg7[%c0_73, %c0_74] : memref<2x8xf32, #tpu.memory_space<vmem>>, vector<2x8xf32>
    tpu.vector_store %arg7[%c0_73, %c0_74], %255 {strides = array<i32>} : memref<2x8xf32, #tpu.memory_space<vmem>>, vector<2x8xf32>,
    return
  }
  func.func @transform_0(%arg0: i32) -> (i32, i32) {
    %c0_i32 = arith.constant 0 : i32
    %c0_i32_0 = arith.constant 0 : i32
    return %arg0, %c0_i32 : i32, i32
  }
  func.func @transform_1(%arg0: i32) -> (i32, i32) {
    %c0_i32 = arith.constant 0 : i32
    %c0_i32_0 = arith.constant 0 : i32
    %c0_i32_1 = arith.constant 0 : i32
    return %c0_i32, %c0_i32_0 : i32, i32
  }
  func.func @transform_2(%arg0: i32) -> (i32, i32) {
    %c0_i32 = arith.constant 0 : i32
    %c0_i32_0 = arith.constant 0 : i32
    %c0_i32_1 = arith.constant 0 : i32
    return %c0_i32, %c0_i32_0 : i32, i32
  }
  func.func @transform_3(%arg0: i32) -> (i32, i32) {
    %c0_i32 = arith.constant 0 : i32
    %c0_i32_0 = arith.constant 0 : i32
    %c0_i32_1 = arith.constant 0 : i32
    return %c0_i32, %c0_i32_0 : i32, i32
  }
  func.func @transform_4(%arg0: i32) -> (i32, i32) {
    %c0_i32 = arith.constant 0 : i32
    %c0_i32_0 = arith.constant 0 : i32
    %c0_i32_1 = arith.constant 0 : i32
    return %c0_i32, %c0_i32_0 : i32, i32
  }
  func.func @transform_5(%arg0: i32) -> (i32, i32) {
    %c0_i32 = arith.constant 0 : i32
    %c0_i32_0 = arith.constant 0 : i32
    %c0_i32_1 = arith.constant 0 : i32
    return %c0_i32, %c0_i32_0 : i32, i32
  }
  func.func @transform_6(%arg0: i32) -> (i32, i32) {
    %c0_i32 = arith.constant 0 : i32
    %c0_i32_0 = arith.constant 0 : i32
    return %arg0, %c0_i32 : i32, i32
  }
}

</mosaic_0001>

<bundles_post_ra>
// kernel: anomaly_score.2
= control target key start
LH: loop header
LB: loop body
LE: loop exit
PB: predicated region body
PF: predicated region fallthrough
CT: control target
= control target key end

     0   :  { %vm42_vm0 = vcmask 261120   ;;  %vm141_vm1 = vcmask 523264   ;;  %v430_v33 = vmov 0.0|0.0   ;;  %vm431_vm2 = vmmov 0   ;;  %s531_s2 = inlined_call_operand.vmem [shape: f32[32,64], index: 2, kind: input, shape index: {}]   ;;  %s532_s0 = inlined_call_operand.vmem [shape: f32[16,32], index: 0, kind: input, shape index: {}]   ;;  %s533_s1 = inlined_call_operand.vmem [shape: f32[16,32], index: 1, kind: input, shape index: {}]   ;;  %s534_s4 = inlined_call_operand.vmem [shape: f32[64,32], index: 4, kind: input, shape index: {}]   ;;  %s535_s3 = inlined_call_operand.vmem [shape: f32[1,64], index: 3, kind: input, shape index: {}]   ;;  %s536_s5 = inlined_call_operand.vmem [shape: f32[1,32], index: 5, kind: input, shape index: {}]   ;;  %s537_s6 = inlined_call_operand.vmem [shape: f32[1,16], index: 6, kind: output, shape index: {}]  }
   0x1   :  { %v31_v0 = vld [vmem:[%s531_s2] sm:$0xff]  ;;  %v32_v1 = vld [vmem:[%s531_s2 + $0x8] sm:$0xff]  ;;  %v33_v2 = vld [vmem:[%s531_s2 + $0x10] sm:$0xff]  ;;  %v432_v34 = vmov 0.0   ;;  %v433_v51 = vmov 1.0   ;;  %vm317_vm4 = vcmask 122880  }
   0x2   :  { %v390_v3 = vpack.c.bf16 %v32_v1, %v31_v0  ;;  %v34_v4 = vld [vmem:[%s531_s2 + $0x18] sm:$0xff]  ;;  %v23_v5 = vld [vmem:[%s532_s0] sm:$0xff]  ;;  %v24_v6 = vld [vmem:[%s532_s0 + $0x8] sm:$0xff] }
   0x3   :  { %v394_v7 = vpack.c.bf16 %v34_v4, %v33_v2  ;;  %v25_v8 = vld [vmem:[%s533_s1] sm:$0xff]  ;;  %v26_v9 = vld [vmem:[%s533_s1 + $0x8] sm:$0xff]  ;;  %v128_v14 = vld [vmem:[%s534_s4 + $0x10] sm:$0xff] }
   0x4   :  { %v126_v10 = vld [vmem:[%s534_s4] sm:$0xff]  ;;  %391 = vmatprep.subr.bf16.mxu0 %v390_v3  ;;  %v27_v11 = vsub.f32 %v23_v5, %v25_v8  ;;  %v28_v12 = vsub.f32 %v24_v6, %v26_v9  ;;  %v127_v13 = vld [vmem:[%s534_s4 + $0x8] sm:$0xff]  ;;  %v129_v15 = vld [vmem:[%s534_s4 + $0x18] sm:$0xff] }
   0x5   :  { %393 = vmatpush3.bf16.msra.mxu0 %v390_v3  ;;  %v398_v16 = vpack.c.bf16 %v127_v13, %v126_v10  ;;  %v402_v17 = vpack.c.bf16 %v129_v15, %v128_v14  ;;  %v130_v19 = vld [vmem:[%s534_s4 + $0x20] sm:$0xff]  ;;  %v131_v20 = vld [vmem:[%s534_s4 + $0x28] sm:$0xff]  ;;  %v132_v23 = vld [vmem:[%s534_s4 + $0x30] sm:$0xff] }
   0x6   :  { %395 = vmatprep.subr.bf16.mxu0 %v394_v7  ;;  %v29_v18 = vand.u32 2147483647, %v27_v11  ;;  %v30_v21 = vand.u32 2147483647, %v28_v12  ;;  %v406_v22 = vpack.c.bf16 %v131_v20, %v130_v19  ;;  %v133_v24 = vld [vmem:[%s534_s4 + $0x38] sm:$0xff]  ;;  %vm416_vm3 = vmpackc.low %vm42_vm0, %vm42_vm0 }
   0x7   :  { %399 = vmatprep.subr.bf16.mxu1 %v398_v16  ;;  %v410_v25 = vpack.c.bf16 %v133_v24, %v132_v23  ;;  %v323_v26 = vld [vmem:[%s535_s3] ss:$0 sm:$0xff] }
   0x8   :  { %361 = vmatprep.mubr.msk.f32.mxu0 %vm42_vm0, %v29_v18  ;;  %401 = vmatpush3.bf16.msra.mxu1 %v398_v16  ;;  %v326_v35 = vld [vmem:[%s536_s5] ss:$0 sm:$0xff] }
   0x9   :  { %397 = vmatpush3.bf16.msra.mxu0 %v394_v7  ;;  %403 = vmatprep.subr.bf16.mxu1 %v402_v17 }
   0xa   :  { %414 = vmatprep.subr.bf16.mxu0 %v430_v33 }
   0xc   :  { %362 = vmatmul.mubr.msk.f32.vlgmr.msra.gmra.mrb[0].mxu0 %vm42_vm0, %v30_v21  ;;  %405 = vmatpush3.bf16.msra.mxu1 %v402_v17 }
   0xd   :  { %407 = vmatprep.subr.bf16.mxu1 %v406_v22  ;;  %387 = vmatprep.mubr.msk.f32.mxu0 %vm431_vm2, %v432_v34 }
  0x10   :  { %409 = vmatpush3.bf16.msra.mxu1 %v406_v22 }
  0x11   :  { %411 = vmatprep.subr.bf16.mxu1 %v410_v25 }
  0x14   :  { %413 = vmatpush3.bf16.msra.mxu1 %v410_v25 }
  0xdf   :  { %v363_v27 = vpop.f32.mrb[0].mxu0 }
  0xe0   :  { %v121_v28 = vadd.f32 %v363_v27, %v323_v26  ;;  %v115_v29 = vpop.f32.mrb[1].mxu0 }
  0xe1   :  { %v116_v30 = vadd.f32 %v323_v26, %v115_v29 }
  0xe2   :  { %v125_v32 = vmax.f32 %v121_v28, 0.0 }
  0xe3   :  { %v124_v31 = vmax.f32 %v116_v30, 0.0 }
  0xe5   :  { %380 = vmatprep.mubr.msk.f32.mxu1 %vm141_vm1, %v124_v31 }
  0xe6   :  { %381 = vmatmul.mubr.msk.f32.vlgmr.msra.gmra.mrb[0].mxu1 %vm141_vm1, %v125_v32 }
 0x1b9   :  { %v382_v36 = vpop.f32.mrb[0].mxu1 }
 0x1ba   :  { %v220_v37 = vadd.f32 %v382_v36, %v326_v35  ;;  %v214_v38 = vpop.f32.mrb[1].mxu1 }
 0x1bb   :  { %v215_v39 = vadd.f32 %v326_v35, %v214_v38 }
 0x1bc   :  { %v330_v40 = vmul.f32 -1.442695, %v220_v37 }
 0x1bd   :  { %v329_v41 = vmul.f32 -1.442695, %v215_v39 }
 0x1be   :  { %422 = vpow2.f32 %v330_v40 }
 0x1bf   :  { %424 = vpow2.f32 %v329_v41 }
 0x1c8   :  { %v423_v42 = vpop.eup %422 }
 0x1c9   :  { %v425_v43 = vpop.eup %424  ;;  %v230_v44 = vadd.f32 1.0, %v423_v42 }
 0x1ca   :  { %v229_v45 = vadd.f32 1.0, %v425_v43 }
 0x1cb   :  { %426 = vrcp.f32 %v230_v44 }
 0x1cc   :  { %428 = vrcp.f32 %v229_v45 }
 0x1d5   :  { %v427_v46 = vpop.eup %426 }
 0x1d6   :  { %v429_v47 = vpop.eup %428  ;;  %v236_v48 = vmul.f32 %v427_v46, %v30_v21 }
 0x1d7   :  { %v235_v49 = vmul.f32 %v429_v47, %v29_v18 }
 0x1d9   :  { %v415_v50 = vpack.c.bf16 %v236_v48, %v235_v49 }
 0x1db   :  { %417 = vmatpush3.bf16.xpose.msk.msra.mxu0 %vm416_vm3, %v415_v50 }
 0x1e2   :  { %388 = vmatmul.mubr.msk.f32.vlgmr.msra.gmra.mrb[2].mxu0 %vm42_vm0, %v433_v51 }
 0x2b5   :  { %v312_v52 = vpop.f32.mrb[2].mxu0 }
 0x2b6   :  { %v316_v53 = vmul.f32 0.03125, %v312_v52  ;;  %v389_v54 = vpop.f32.mrb[3].mxu0 }
 0x2b8   :  { %318 = vst.msk [vmem:[%s537_s6] sm:$0x1] %vm317_vm4, %v316_v53 }

// kernel: anomaly_score.3
= control target key start
LH: loop header
LB: loop body
LE: loop exit
PB: predicated region body
PF: predicated region fallthrough
CT: control target
= control target key end

     0   :  { %s2153_s0 = inlined_call_operand.vmem [shape: f32[2,8], index: 0, kind: input, shape index: {}]   ;;  %s2154_s1 = inlined_call_operand.vmem [shape: f32[32,1], index: 1, kind: input, shape index: {}]   ;;  %s2155_s2 = inlined_call_operand.vmem [shape: f32[32,8], index: 2, kind: input, shape index: {}]   ;;  %s2156_s3 = inlined_call_operand.vmem [shape: f32[32,1], index: 3, kind: input, shape index: {}]   ;;  %s2157_s4 = inlined_call_operand.vmem [shape: f32[8,1], index: 4, kind: input, shape index: {}]   ;;  %s2158_s5 = inlined_call_operand.<no memory space> [shape: f32[1,1], index: 5, kind: input, shape index: {}]   ;;  %s2159_s6 = inlined_call_operand.hbm [shape: f32[2,8], index: 6, kind: output, shape index: {}]  }
   0x1   :  { %v11_v0 = vstv %s2158_s5 }
   0x2   :  { %12 = vst [vmem:[#allocation4] sm:$0x1] %v11_v0 }
   0x3   :  { %v39_v1 = vld [vmem:[%s2153_s0] sm:$0x3]  ;;  %vm46_vm0 = vcmask 64512   ;;  %v40_v2 = vlaneseq  ;;  %v1840_v4 = vmov 0.0   ;;  %vm1841_vm1 = vmmov 0   ;;  %v1897_v5 = vld [vmem:[%s2155_s2 + $0x8] sm:$0xff] }
   0x4   :  { %v1889_v3 = vld [vmem:[%s2155_s2] sm:$0xff]  ;;  %1600 = vmatprep.subr.mxu0 %v1840_v4  ;;  %1602 = vmatprep.mubr.msk.f32.mxu0 %vm1841_vm1, %v1840_v4  ;;  %v1904_v8 = vld [vmem:[%s2155_s2 + $0x10] sm:$0xff]  ;;  %v1842_v10 = vmov 0   ;;  %v1925_v13 = vld [vmem:[%s2155_s2 + $0x18] sm:$0xff] }
   0x5   :  { %1601 = vmatpush3.xpose.msk.msra.mxu0 %vm46_vm0, %v39_v1  ;;  %v41_v6 = vshrl.u32 %v40_v2, 7  ;;  %v43_v7 = vand.u32 127, %v40_v2  ;;  %1605 = vmatprep.subr.mxu1 %v1840_v4  ;;  %v26_v9 = vld [vmem:[%s2154_s1] sm:$0xff] }
   0x6   :  { %1606 = vmatpush3.msra.mxu1 %v1840_v4  ;;  %1607 = vmatprep.mubr.msk.f32.mxu1 %vm46_vm0, %v1889_v3  ;;  %v34_v11 = vld [vmem:[%s2156_s3] sm:$0xff] }
   0x7   :  { %vm44_vm2 = vcmp.eq.s32.totalorder %v41_v6, %v43_v7  ;;  %1608 = vmatmul.mubr.msk.f32.vlgmr.msra.gmra.mrb[0].mxu1 %vm46_vm0, %v1897_v5  ;;  %1679 = vset.pattern.permute.xlu0 %v1842_v10 }
   0x8   :  { %v1918_v12 = vsel %vm44_vm2, 1.0, %v1840_v4  ;;  %1610 = vmatprep.mubr.msk.f32.mxu1 %vm46_vm0, %v1904_v8  ;;  %175 = vperm.xlu0 %1679, %v26_v9  }
   0x9   :  { %13 = vsyncpa [#allocation6], 0  ;;  %1603 = vmatmul.mubr.msk.f32.vlgmr.msra.gmra.mrb[0].mxu0 %vm46_vm0, %v1918_v12  ;;  %1680 = vset.pattern.permute.xlu1 %v1842_v10  ;;  %v27_v14 = vld [vmem:[%s2154_s1 + $0x8] sm:$0xff]  ;;  %v28_v16 = vld [vmem:[%s2154_s1 + $0x10] sm:$0xff]  ;;  %v1843_v22 = vmov 1966171168  }
   0xa   :  { %267 = vperm.xlu1 %1680, %v34_v11   ;;  %1615 = vmatprep.mubr.msk.f32.mxu0 %vm46_vm0, %v1889_v3  ;;  %v35_v15 = vld [vmem:[%s2156_s3 + $0x8] sm:$0xff]  ;;  %v29_v17 = vld [vmem:[%s2154_s1 + $0x18] sm:$0xff]  ;;  %v36_v18 = vld [vmem:[%s2156_s3 + $0x10] sm:$0xff]  ;;  %v126_v23 = vunpack.c.l.s4 %v1843_v22  ;;  %v195_v34 = vsub.s32 0, %v41_v6  ;;  %vm317_vm3 = vcmask 15360   ;;  %vm492_vm4 = vcmask 8192  }
   0xb   :  { %1611 = vmatmul.mubr.msk.f32.gmra.mrb[2].mxu1 %vm46_vm0, %v1925_v13  ;;  %v37_v19 = vld [vmem:[%s2156_s3 + $0x18] sm:$0xff]  ;;  %v38_v20 = vld [vmem:[%s2157_s4] sm:$0xff]  ;;  %v1554_v21 = vld [vmem:[#allocation4] ss:$0 sm:$0xff]  ;;  %s1844_s29 = smov [#allocation5]   ;;  %vm1478_vm5 = vcmask 58368  }
   0xc   :  { %180 = vperm.xlu0 %1679, %v27_v14   ;;  %1623 = vmatprep.mubr.msk.f32.mxu1 %vm46_vm0, %v1889_v3  ;;  %v127_v24 = vunpack.c.0.s8 %v126_v23  ;;  %s1486_s30 = sshll.u32 %s1844_s29, 4  ;;  %s1487_s30 = int_to_ptr.vmem [resolvable:$true] %s1486_s30 }
   0xd   :  { %s1816_s7 = scalar_lea.vmem %s1487_s30, 32  ;;  %p1821_p1 = scmp.lt.s32.totalorder %s1487_s30, %s1487_s30 }
   0xe   :  { %272 = vperm.xlu1 %1680, %v35_v15   ;;  %v130_v26 = vsub.s32 %v127_v24, %v41_v6  ;;  %p1817_p0 = scmp.ne.s32.totalorder %s1487_s30, %s1816_s7  ;;  %p1822_p2 = scmp.lt.s32.totalorder %s1816_s7, %s1816_s7 }
  0x10   :  { %185 = vperm.xlu0 %1679, %v28_v16   ;;  %p1823_p3 = por %p1822_p2, %p1821_p1 }
  0x12   :  { %190 = vperm.xlu1 %1680, %v29_v17   ;;  %p1824_p4 = pnand %p1823_p3, %p1817_p0 }
  0x14   :  { %277 = vperm.xlu0 %1679, %v36_v18  }
  0x16   :  { %282 = vperm.xlu1 %1680, %v37_v19  }
  0x18   :  { %481 = vperm.xlu0 %1679, %v38_v20  }
  0x1a   :  { %1468 = vperm.xlu1 %1680, %v1554_v21  }
  0x87   :  { %v1956_v25 = vpop.permute.xlu0 %175 }
  0x89   :  { %v1958_v27 = vpop.permute.xlu1 %267 }
  0x8b   :  { %v181_v35 = vpop.permute.xlu0 %180 }
  0x8d   :  { %v1966_v37 = vpop.permute.xlu1 %272 }
  0x8f   :  { %v186_v55 = vpop.permute.xlu0 %185 }
  0x91   :  { %v191_v56 = vpop.permute.xlu1 %190 }
  0xda   :  { %v1960_v28 = vpop.f32.mrb[0].mxu1 }
  0xdb   :  { %v1962_v29 = vpop.f32.mrb[1].mxu1 }
  0xdc   :  { %v119_v30 = vpop.f32.mrb[0].mxu0 }
  0xdd   :  { %v124_v31 = vcombine.high %v119_v30, %v119_v30  ;;  %v131_v32 = vrot.slane %v119_v30, %v130_v26  ;;  %v1604_v33 = vpop.f32.mrb[1].mxu0 }
  0xde   :  { %v1964_v36 = vpop.f32.mrb[2].mxu1 }
  0xdf   :  { %v138_v38 = vrot.slane %v124_v31, %v130_v26  ;;  %v139_v39 = vcombine.high %v131_v32, %v131_v32  ;;  %v147_v40 = vrot.slane %v131_v32, %v130_v26  ;;  %v1968_v41 = vpop.f32.mrb[3].mxu1 }
  0xe1   :  { %v140_v42 = vcombine.high %v138_v38, %v138_v38  ;;  %v154_v43 = vrot.slane %v138_v38, %v130_v26  ;;  %v161_v44 = vrot.slane %v139_v39, %v130_v26  ;;  %v169_v45 = vcombine.high %v147_v40, %v147_v40  ;;  %v278_v38 = vpop.permute.xlu0 %277 }
  0xe2   :  { %v196_v46 = vrot.slane %v147_v40, %v195_v34 }
  0xe3   :  { %v168_v47 = vrot.slane %v140_v42, %v130_v26  ;;  %v170_v48 = vcombine.high %v154_v43, %v154_v43  ;;  %v171_v49 = vcombine.high %v161_v44, %v161_v44  ;;  %v200_v50 = vrot.slane %v161_v44, %v195_v34 }
  0xe4   :  { %v204_v51 = vrot.slane %v169_v45, %v195_v34  ;;  %v212_v52 = vrot.slane %v154_v43, %v195_v34  ;;  %v233_v53 = vmul.f32 %v196_v46, %v1956_v25  ;;  %v234_v54 = vmul.f32 %v196_v46, %v181_v35 }
  0xe5   :  { %v172_v57 = vcombine.high %v168_v47, %v168_v47  ;;  %v208_v58 = vrot.slane %v171_v49, %v195_v34  ;;  %v216_v59 = vrot.slane %v168_v47, %v195_v34  ;;  %v220_v60 = vrot.slane %v170_v48, %v195_v34 }
  0xe6   :  { %v235_v61 = vmul.f32 %v196_v46, %v186_v55  ;;  %v1971_v62 = vmul.f32 %v196_v46, %v191_v56  ;;  %v237_v63 = vmul.f32 %v200_v50, %v1956_v25  ;;  %v238_v0 = vmul.f32 %v200_v50, %v181_v35 }
  0xe7   :  { %v224_v1 = vrot.slane %v172_v57, %v195_v34  ;;  %v239_v2 = vmul.f32 %v200_v50, %v186_v55  ;;  %v1974_v6 = vmul.f32 %v200_v50, %v191_v56  ;;  %v241_v7 = vmul.f32 %v204_v51, %v1956_v25 }
  0xe8   :  { %v242_v9 = vmul.f32 %v204_v51, %v181_v35  ;;  %v243_v10 = vmul.f32 %v204_v51, %v186_v55  ;;  %v1977_v11 = vmul.f32 %v204_v51, %v191_v56  ;;  %v245_v14 = vmul.f32 %v208_v58, %v1956_v25 }
  0xe9   :  { %v246_v15 = vmul.f32 %v208_v58, %v181_v35  ;;  %v247_v16 = vmul.f32 %v208_v58, %v186_v55  ;;  %v1980_v17 = vmul.f32 %v208_v58, %v191_v56  ;;  %v249_v18 = vmul.f32 %v212_v52, %v1956_v25 }
  0xea   :  { %v250_v19 = vmul.f32 %v212_v52, %v181_v35  ;;  %v251_v20 = vmul.f32 %v212_v52, %v186_v55  ;;  %v1983_v21 = vmul.f32 %v212_v52, %v191_v56  ;;  %v253_v22 = vmul.f32 %v216_v59, %v1956_v25 }
  0xeb   :  { %v254_v23 = vmul.f32 %v216_v59, %v181_v35  ;;  %v255_v24 = vmul.f32 %v216_v59, %v186_v55  ;;  %v1986_v26 = vmul.f32 %v216_v59, %v191_v56  ;;  %v257_v30 = vmul.f32 %v220_v60, %v1956_v25 }
  0xec   :  { %v258_v31 = vmul.f32 %v220_v60, %v181_v35  ;;  %v259_v32 = vmul.f32 %v220_v60, %v186_v55  ;;  %v260_v33 = vmul.f32 %v220_v60, %v191_v56  ;;  %v261_v34 = vmul.f32 %v224_v1, %v1956_v25 }
  0xed   :  { %v262_v39 = vmul.f32 %v224_v1, %v181_v35  ;;  %v263_v40 = vmul.f32 %v224_v1, %v186_v55  ;;  %v264_v42 = vmul.f32 %v224_v1, %v191_v56  ;;  %v285_v43 = vadd.f32 %v1958_v27, %v233_v53 }
  0xee   :  { %v286_v44 = vadd.f32 %v1966_v37, %v234_v54  ;;  %v287_v45 = vadd.f32 %v278_v38, %v235_v61  ;;  %v289_v46 = vadd.f32 %v1958_v27, %v237_v63  ;;  %v290_v47 = vadd.f32 %v1966_v37, %v238_v0  ;;  %v283_v63 = vpop.permute.xlu1 %282 }
  0xef   :  { %v291_v48 = vadd.f32 %v278_v38, %v239_v2  ;;  %v293_v49 = vadd.f32 %v1958_v27, %v241_v7  ;;  %v294_v50 = vadd.f32 %v1966_v37, %v242_v9  ;;  %v295_v51 = vadd.f32 %v278_v38, %v243_v10  ;;  %318 = vst.msk [vmem:[#allocation2] sm:$0xff] %vm317_vm3, %v285_v43 }
  0xf0   :  { %v297_v25 = vadd.f32 %v1958_v27, %v245_v14  ;;  %v298_v35 = vadd.f32 %v1966_v37, %v246_v15  ;;  %v299_v52 = vadd.f32 %v278_v38, %v247_v16  ;;  %v301_v53 = vadd.f32 %v1958_v27, %v249_v18  ;;  %319 = vst.msk [vmem:[#allocation2 + $0x8] sm:$0xff] %vm317_vm3, %v286_v44  ;;  %v2048_v44 = vpop.permute.xlu0 %481 }
  0xf1   :  { %320 = vst.msk [vmem:[#allocation2 + $0x10] sm:$0xff] %vm317_vm3, %v287_v45  ;;  %322 = vst.msk [vmem:[#allocation2 + $0x20] sm:$0xff] %vm317_vm3, %v289_v46  ;;  %v302_v54 = vadd.f32 %v1966_v37, %v250_v19  ;;  %v303_v55 = vadd.f32 %v278_v38, %v251_v20  ;;  %v305_v56 = vadd.f32 %v1958_v27, %v253_v22 }
  0xf2   :  { %323 = vst.msk [vmem:[#allocation2 + $0x28] sm:$0xff] %vm317_vm3, %v290_v47  ;;  %v306_v57 = vadd.f32 %v1966_v37, %v254_v23  ;;  %324 = vst.msk [vmem:[#allocation2 + $0x30] sm:$0xff] %vm317_vm3, %v291_v48  ;;  %v307_v58 = vadd.f32 %v278_v38, %v255_v24  ;;  %v309_v59 = vadd.f32 %v1958_v27, %v257_v30 }
  0xf3   :  { %326 = vst.msk [vmem:[#allocation2 + $0x40] sm:$0xff] %vm317_vm3, %v293_v49  ;;  %327 = vst.msk [vmem:[#allocation2 + $0x48] sm:$0xff] %vm317_vm3, %v294_v50  ;;  %v310_v60 = vadd.f32 %v1966_v37, %v258_v31  ;;  %v311_v61 = vadd.f32 %v278_v38, %v259_v32  ;;  %v313_v0 = vadd.f32 %v1958_v27, %v261_v34 }
  0xf4   :  { %328 = vst.msk [vmem:[#allocation2 + $0x50] sm:$0xff] %vm317_vm3, %v295_v51  ;;  %330 = vst.msk [vmem:[#allocation2 + $0x60] sm:$0xff] %vm317_vm3, %v297_v25  ;;  %v314_v1 = vadd.f32 %v1966_v37, %v262_v39  ;;  %v315_v2 = vadd.f32 %v278_v38, %v263_v40  ;;  %v288_v7 = vadd.f32 %v283_v63, %v1971_v62 }
  0xf5   :  { %331 = vst.msk [vmem:[#allocation2 + $0x68] sm:$0xff] %vm317_vm3, %v298_v35  ;;  %332 = vst.msk [vmem:[#allocation2 + $0x70] sm:$0xff] %vm317_vm3, %v299_v52  ;;  %v292_v27 = vadd.f32 %v283_v63, %v1974_v6  ;;  %v296_v37 = vadd.f32 %v283_v63, %v1977_v11  ;;  %v300_v9 = vadd.f32 %v283_v63, %v1980_v17 }
  0xf6   :  { %334 = vst.msk [vmem:[#allocation2 + $0x80] sm:$0xff] %vm317_vm3, %v301_v53  ;;  %335 = vst.msk [vmem:[#allocation2 + $0x88] sm:$0xff] %vm317_vm3, %v302_v54  ;;  %v304_v10 = vadd.f32 %v283_v63, %v1983_v21  ;;  %v308_v62 = vadd.f32 %v283_v63, %v1986_v26  ;;  %v312_v14 = vadd.f32 %v283_v63, %v260_v33  ;;  %v447_v6 = vld [vmem:[#allocation2] sm:$0xff] }
  0xf7   :  { %336 = vst.msk [vmem:[#allocation2 + $0x90] sm:$0xff] %vm317_vm3, %v303_v55  ;;  %338 = vst.msk [vmem:[#allocation2 + $0xa0] sm:$0xff] %vm317_vm3, %v305_v56  ;;  %v316_v15 = vadd.f32 %v283_v63, %v264_v42  ;;  %v448_v11 = vld [vmem:[#allocation2 + $0x8] sm:$0xff]  ;;  %v451_v16 = vadd.f32 %v447_v6, %v1962_v29 }
  0xf8   :  { %339 = vst.msk [vmem:[#allocation2 + $0xa8] sm:$0xff] %vm317_vm3, %v306_v57  ;;  %340 = vst.msk [vmem:[#allocation2 + $0xb0] sm:$0xff] %vm317_vm3, %v307_v58  ;;  %v452_v17 = vadd.f32 %v1960_v28, %v448_v11  ;;  %v449_v20 = vld [vmem:[#allocation2 + $0x10] sm:$0xff]  ;;  %v580_v55 = vld [vmem:[#allocation2 + $0x20] sm:$0xff] }
  0xf9   :  { %342 = vst.msk [vmem:[#allocation2 + $0xc0] sm:$0xff] %vm317_vm3, %v309_v59  ;;  %343 = vst.msk [vmem:[#allocation2 + $0xc8] sm:$0xff] %vm317_vm3, %v310_v60  ;;  %v1500_v18 = vmul.f32 -1.442695, %v451_v16  ;;  %v453_v21 = vadd.f32 %v449_v20, %v1968_v41  ;;  %v581_v52 = vld [vmem:[#allocation2 + $0x28] sm:$0xff] }
  0xfa   :  { %344 = vst.msk [vmem:[#allocation2 + $0xd0] sm:$0xff] %vm317_vm3, %v311_v61  ;;  %346 = vst.msk [vmem:[#allocation2 + $0xe0] sm:$0xff] %vm317_vm3, %v313_v0  ;;  %v1501_v19 = vmul.f32 -1.442695, %v452_v17  ;;  %v582_v61 = vld [vmem:[#allocation2 + $0x30] sm:$0xff] }
  0xfb   :  { %347 = vst.msk [vmem:[#allocation2 + $0xe8] sm:$0xff] %vm317_vm3, %v314_v1  ;;  %348 = vst.msk [vmem:[#allocation2 + $0xf0] sm:$0xff] %vm317_vm3, %v315_v2  ;;  %1681 = vpow2.f32 %v1500_v18  ;;  %v1502_v23 = vmul.f32 -1.442695, %v453_v21 }
  0xfc   :  { %321 = vst.msk [vmem:[#allocation2 + $0x18] sm:$0xff] %vm317_vm3, %v288_v7  ;;  %325 = vst.msk [vmem:[#allocation2 + $0x38] sm:$0xff] %vm317_vm3, %v292_v27  ;;  %1683 = vpow2.f32 %v1501_v19 }
  0xfd   :  { %329 = vst.msk [vmem:[#allocation2 + $0x58] sm:$0xff] %vm317_vm3, %v296_v37  ;;  %333 = vst.msk [vmem:[#allocation2 + $0x78] sm:$0xff] %vm317_vm3, %v300_v9  ;;  %1685 = vpow2.f32 %v1502_v23 }
  0xfe   :  { %337 = vst.msk [vmem:[#allocation2 + $0x98] sm:$0xff] %vm317_vm3, %v304_v10  ;;  %341 = vst.msk [vmem:[#allocation2 + $0xb8] sm:$0xff] %vm317_vm3, %v308_v62 }
  0xff   :  { %345 = vst.msk [vmem:[#allocation2 + $0xd8] sm:$0xff] %vm317_vm3, %v312_v14  ;;  %349 = vst.msk [vmem:[#allocation2 + $0xf8] sm:$0xff] %vm317_vm3, %v316_v15 }
 0x103   :  { %v450_v22 = vld [vmem:[#allocation2 + $0x18] sm:$0xff] }
 0x104   :  { %v454_v24 = vadd.f32 %v1964_v36, %v450_v22  ;;  %v583_v0 = vld [vmem:[#allocation2 + $0x38] sm:$0xff] }
 0x105   :  { %v1682_v26 = vpop.eup %1681 }
 0x106   :  { %v1684_v30 = vpop.eup %1683  ;;  %v464_v31 = vadd.f32 1.0, %v1682_v26  ;;  %1687 = vtanh.f32 %v454_v24 }
 0x107   :  { %v465_v32 = vadd.f32 1.0, %v1684_v30  ;;  %v1686_v28 = vpop.eup %1685 }
 0x108   :  { %1689 = vrcp.f32 %v464_v31  ;;  %v466_v39 = vadd.f32 1.0, %v1686_v28 }
 0x109   :  { %1691 = vrcp.f32 %v465_v32 }
 0x10a   :  { %1693 = vrcp.f32 %v466_v39 }
 0x110   :  { %v1688_v29 = vpop.eup %1687 }
 0x112   :  { %v1690_v33 = vpop.eup %1689 }
 0x113   :  { %v1692_v34 = vpop.eup %1691  ;;  %v475_v38 = vmul.f32 %v1690_v33, %v1688_v29  ;;  %v708_v29 = vld [vmem:[#allocation2 + $0x48] sm:$0xff] }
 0x114   :  { %v474_v40 = vmul.f32 0.0, %v1692_v34  ;;  %v1694_v42 = vpop.eup %1693 }
 0x116   :  { %v476_v41 = vadd.f32 %v475_v38, %v474_v40  ;;  %v707_v38 = vld [vmem:[#allocation2 + $0x40] sm:$0xff] }
 0x118   :  { %1695 = vtanh.f32 %v476_v41 }
 0x122   :  { %v1696_v36 = vpop.eup %1695 }
 0x123   :  { %v478_v43 = vmul.f32 %v1696_v36, %v1694_v42 }
 0x125   :  { %v484_v45 = vmul.f32 %v2048_v44, %v478_v43  ;;  %1613 = vmatprep.subr.mxu0 %v478_v43 }
 0x126   :  { %1614 = vmatpush3.msra.mxu0 %v478_v43  ;;  %v709_v43 = vld [vmem:[#allocation2 + $0x50] sm:$0xff] }
 0x127   :  { %v485_v46 = vsel %vm317_vm3, %v484_v45, 0.0  ;;  %1616 = vmatmul.mubr.msk.f32.vlgmr.msra.gmra.mrb[2].mxu0 %vm46_vm0, %v1897_v5 }
 0x128   :  { %v486_v47 = vrot.slane %v485_v46, 4  ;;  %1618 = vmatprep.mubr.msk.f32.mxu0 %vm46_vm0, %v1904_v8 }
 0x12a   :  { %v487_v48 = vadd.f32 %v486_v47, %v485_v46  ;;  %v710_v46 = vld [vmem:[#allocation2 + $0x58] sm:$0xff] }
 0x12b   :  { %1619 = vmatmul.mubr.msk.f32.gmra.mrb[4].mxu0 %vm46_vm0, %v1925_v13 }
 0x12c   :  { %v488_v49 = vrot.slane %v487_v48, 2  ;;  %1631 = vmatprep.mubr.msk.f32.mxu0 %vm46_vm0, %v1889_v3 }
 0x12e   :  { %v489_v50 = vadd.f32 %v488_v49, %v487_v48 }
 0x130   :  { %v490_v51 = vrot.slane %v489_v50, 1 }
 0x132   :  { %v491_v25 = vadd.f32 %v490_v51, %v489_v50 }
 0x134   :  { %493 = vst.msk [vmem:[#allocation3] sm:$0x1] %vm492_vm4, %v491_v25 }
 0x1fa   :  { %v1617_v35 = vpop.f32.mrb[2].mxu0 }
 0x1fb   :  { %v585_v53 = vadd.f32 %v1617_v35, %v581_v52  ;;  %v560_v54 = vpop.f32.mrb[3].mxu0 }
 0x1fc   :  { %v584_v56 = vadd.f32 %v580_v55, %v560_v54 }
 0x1fd   :  { %v1508_v57 = vmul.f32 -1.442695, %v585_v53 }
 0x1fe   :  { %v1507_v58 = vmul.f32 -1.442695, %v584_v56  ;;  %v1620_v59 = vpop.f32.mrb[4].mxu0 }
 0x1ff   :  { %1697 = vpow2.f32 %v1508_v57  ;;  %v570_v60 = vpop.f32.mrb[5].mxu0  ;;  %v587_v2 = vadd.f32 %v1620_v59, %v583_v0 }
 0x200   :  { %1699 = vpow2.f32 %v1507_v58  ;;  %v586_v63 = vadd.f32 %v582_v61, %v570_v60 }
 0x202   :  { %v1509_v1 = vmul.f32 -1.442695, %v586_v63 }
 0x204   :  { %1701 = vpow2.f32 %v1509_v1 }
 0x205   :  { %1703 = vtanh.f32 %v587_v2 }
 0x209   :  { %v1698_v7 = vpop.eup %1697 }
 0x20a   :  { %v1700_v27 = vpop.eup %1699  ;;  %v598_v37 = vadd.f32 1.0, %v1698_v7 }
 0x20b   :  { %v597_v9 = vadd.f32 1.0, %v1700_v27 }
 0x20c   :  { %1705 = vrcp.f32 %v598_v37 }
 0x20d   :  { %1707 = vrcp.f32 %v597_v9 }
 0x20e   :  { %v1702_v10 = vpop.eup %1701 }
 0x20f   :  { %v1704_v62 = vpop.eup %1703  ;;  %v599_v11 = vadd.f32 1.0, %v1702_v10 }
 0x211   :  { %1709 = vrcp.f32 %v599_v11 }
 0x216   :  { %v1706_v14 = vpop.eup %1705 }
 0x217   :  { %v1708_v15 = vpop.eup %1707  ;;  %v607_v6 = vmul.f32 %v1706_v14, %v476_v41 }
 0x218   :  { %v608_v16 = vmul.f32 %v1708_v15, %v1704_v62  ;;  %v835_v62 = vld [vmem:[#allocation2 + $0x68] sm:$0xff] }
 0x21a   :  { %v609_v17 = vadd.f32 %v608_v16, %v607_v6  ;;  %v834_v6 = vld [vmem:[#allocation2 + $0x60] sm:$0xff] }
 0x21b   :  { %v1710_v18 = vpop.eup %1709 }
 0x21c   :  { %1711 = vtanh.f32 %v609_v17 }
 0x226   :  { %v1712_v19 = vpop.eup %1711 }
 0x227   :  { %v611_v20 = vmul.f32 %v1712_v19, %v1710_v18 }
 0x229   :  { %v612_v21 = vmul.f32 %v611_v20, %v2048_v44  ;;  %1621 = vmatprep.subr.mxu1 %v611_v20 }
 0x22a   :  { %1622 = vmatpush3.msra.mxu1 %v611_v20  ;;  %v836_v20 = vld [vmem:[#allocation2 + $0x70] sm:$0xff] }
 0x22b   :  { %v613_v22 = vsel %vm317_vm3, %v612_v21, 0.0  ;;  %1624 = vmatmul.mubr.msk.f32.vlgmr.msra.gmra.mrb[4].mxu1 %vm46_vm0, %v1897_v5 }
 0x22c   :  { %v614_v23 = vrot.slane %v613_v22, 4  ;;  %1626 = vmatprep.mubr.msk.f32.mxu1 %vm46_vm0, %v1904_v8 }
 0x22e   :  { %v615_v24 = vadd.f32 %v614_v23, %v613_v22  ;;  %v837_v22 = vld [vmem:[#allocation2 + $0x78] sm:$0xff] }
 0x22f   :  { %1627 = vmatmul.mubr.msk.f32.gmra.mrb[6].mxu1 %vm46_vm0, %v1925_v13 }
 0x230   :  { %v616_v26 = vrot.slane %v615_v24, 2  ;;  %1639 = vmatprep.mubr.msk.f32.mxu1 %vm46_vm0, %v1889_v3 }
 0x232   :  { %v617_v30 = vadd.f32 %v616_v26, %v615_v24 }
 0x234   :  { %v618_v31 = vrot.slane %v617_v30, 1 }
 0x236   :  { %v619_v32 = vadd.f32 %v618_v31, %v617_v30 }
 0x238   :  { %620 = vst.msk [vmem:[#allocation3 + $0x1] sm:$0x1] %vm492_vm4, %v619_v32 }
 0x2fe   :  { %v1625_v28 = vpop.f32.mrb[4].mxu1 }
 0x2ff   :  { %v712_v33 = vadd.f32 %v1625_v28, %v708_v29  ;;  %v687_v34 = vpop.f32.mrb[5].mxu1 }
 0x300   :  { %v711_v39 = vadd.f32 %v707_v38, %v687_v34 }
 0x301   :  { %v1515_v40 = vmul.f32 -1.442695, %v712_v33 }
 0x302   :  { %v1514_v41 = vmul.f32 -1.442695, %v711_v39  ;;  %v1628_v42 = vpop.f32.mrb[6].mxu1 }
 0x303   :  { %1713 = vpow2.f32 %v1515_v40  ;;  %v697_v36 = vpop.f32.mrb[7].mxu1  ;;  %v714_v48 = vadd.f32 %v1628_v42, %v710_v46 }
 0x304   :  { %1715 = vpow2.f32 %v1514_v41  ;;  %v713_v45 = vadd.f32 %v709_v43, %v697_v36 }
 0x306   :  { %v1516_v47 = vmul.f32 -1.442695, %v713_v45 }
 0x308   :  { %1717 = vpow2.f32 %v1516_v47 }
 0x309   :  { %1719 = vtanh.f32 %v714_v48 }
 0x30d   :  { %v1714_v49 = vpop.eup %1713 }
 0x30e   :  { %v1716_v50 = vpop.eup %1715  ;;  %v725_v51 = vadd.f32 1.0, %v1714_v49 }
 0x30f   :  { %v724_v25 = vadd.f32 1.0, %v1716_v50 }
 0x310   :  { %1721 = vrcp.f32 %v725_v51 }
 0x311   :  { %1723 = vrcp.f32 %v724_v25 }
 0x312   :  { %v1718_v35 = vpop.eup %1717 }
 0x313   :  { %v1720_v52 = vpop.eup %1719  ;;  %v726_v56 = vadd.f32 1.0, %v1718_v35 }
 0x315   :  { %1725 = vrcp.f32 %v726_v56 }
 0x31a   :  { %v1722_v53 = vpop.eup %1721 }
 0x31b   :  { %v1724_v54 = vpop.eup %1723  ;;  %v734_v55 = vmul.f32 %v1722_v53, %v609_v17 }
 0x31c   :  { %v735_v57 = vmul.f32 %v1724_v54, %v1720_v52  ;;  %v962_v52 = vld [vmem:[#allocation2 + $0x88] sm:$0xff] }
 0x31e   :  { %v736_v58 = vadd.f32 %v735_v57, %v734_v55  ;;  %v961_v55 = vld [vmem:[#allocation2 + $0x80] sm:$0xff] }
 0x31f   :  { %v1726_v59 = vpop.eup %1725 }
 0x320   :  { %1727 = vtanh.f32 %v736_v58 }
 0x32a   :  { %v1728_v60 = vpop.eup %1727 }
 0x32b   :  { %v738_v61 = vmul.f32 %v1728_v60, %v1726_v59 }
 0x32d   :  { %v739_v63 = vmul.f32 %v738_v61, %v2048_v44  ;;  %1629 = vmatprep.subr.mxu0 %v738_v61 }
 0x32e   :  { %1630 = vmatpush3.msra.mxu0 %v738_v61  ;;  %v963_v61 = vld [vmem:[#allocation2 + $0x90] sm:$0xff] }
 0x32f   :  { %v740_v0 = vsel %vm317_vm3, %v739_v63, 0.0  ;;  %1632 = vmatmul.mubr.msk.f32.vlgmr.msra.gmra.mrb[6].mxu0 %vm46_vm0, %v1897_v5 }
 0x330   :  { %v741_v1 = vrot.slane %v740_v0, 4  ;;  %1634 = vmatprep.mubr.msk.f32.mxu0 %vm46_vm0, %v1904_v8 }
 0x332   :  { %v742_v2 = vadd.f32 %v741_v1, %v740_v0  ;;  %v964_v0 = vld [vmem:[#allocation2 + $0x98] sm:$0xff] }
 0x333   :  { %1635 = vmatmul.mubr.msk.f32.gmra.mrb[8].mxu0 %vm46_vm0, %v1925_v13 }
 0x334   :  { %v743_v7 = vrot.slane %v742_v2, 2  ;;  %1647 = vmatprep.mubr.msk.f32.mxu0 %vm46_vm0, %v1889_v3 }
 0x336   :  { %v744_v27 = vadd.f32 %v743_v7, %v742_v2 }
 0x338   :  { %v745_v37 = vrot.slane %v744_v27, 1 }
 0x33a   :  { %v746_v9 = vadd.f32 %v745_v37, %v744_v27 }
 0x33c   :  { %747 = vst.msk [vmem:[#allocation3 + $0x2] sm:$0x1] %vm492_vm4, %v746_v9 }
 0x402   :  { %v1633_v10 = vpop.f32.mrb[6].mxu0 }
 0x403   :  { %v839_v14 = vadd.f32 %v1633_v10, %v835_v62  ;;  %v814_v15 = vpop.f32.mrb[7].mxu0 }
 0x404   :  { %v838_v11 = vadd.f32 %v834_v6, %v814_v15 }
 0x405   :  { %v1522_v16 = vmul.f32 -1.442695, %v839_v14 }
 0x406   :  { %v1521_v17 = vmul.f32 -1.442695, %v838_v11  ;;  %v1636_v18 = vpop.f32.mrb[8].mxu0 }
 0x407   :  { %1729 = vpow2.f32 %v1522_v16  ;;  %v824_v19 = vpop.f32.mrb[9].mxu0  ;;  %v841_v24 = vadd.f32 %v1636_v18, %v837_v22 }
 0x408   :  { %1731 = vpow2.f32 %v1521_v17  ;;  %v840_v21 = vadd.f32 %v836_v20, %v824_v19 }
 0x40a   :  { %v1523_v23 = vmul.f32 -1.442695, %v840_v21 }
 0x40c   :  { %1733 = vpow2.f32 %v1523_v23 }
 0x40d   :  { %1735 = vtanh.f32 %v841_v24 }
 0x411   :  { %v1730_v26 = vpop.eup %1729 }
 0x412   :  { %v1732_v30 = vpop.eup %1731  ;;  %v852_v31 = vadd.f32 1.0, %v1730_v26 }
 0x413   :  { %v851_v32 = vadd.f32 1.0, %v1732_v30 }
 0x414   :  { %1737 = vrcp.f32 %v852_v31 }
 0x415   :  { %1739 = vrcp.f32 %v851_v32 }
 0x416   :  { %v1734_v28 = vpop.eup %1733 }
 0x417   :  { %v1736_v29 = vpop.eup %1735  ;;  %v853_v39 = vadd.f32 1.0, %v1734_v28 }
 0x419   :  { %1741 = vrcp.f32 %v853_v39 }
 0x41e   :  { %v1738_v33 = vpop.eup %1737 }
 0x41f   :  { %v1740_v34 = vpop.eup %1739  ;;  %v861_v38 = vmul.f32 %v1738_v33, %v736_v58 }
 0x420   :  { %v862_v40 = vmul.f32 %v1740_v34, %v1736_v29  ;;  %v1089_v29 = vld [vmem:[#allocation2 + $0xa8] sm:$0xff] }
 0x422   :  { %v863_v41 = vadd.f32 %v862_v40, %v861_v38  ;;  %v1088_v38 = vld [vmem:[#allocation2 + $0xa0] sm:$0xff] }
 0x423   :  { %v1742_v42 = vpop.eup %1741 }
 0x424   :  { %1743 = vtanh.f32 %v863_v41 }
 0x42e   :  { %v1744_v36 = vpop.eup %1743 }
 0x42f   :  { %v865_v43 = vmul.f32 %v1744_v36, %v1742_v42 }
 0x431   :  { %v866_v45 = vmul.f32 %v865_v43, %v2048_v44  ;;  %1637 = vmatprep.subr.mxu1 %v865_v43 }
 0x432   :  { %1638 = vmatpush3.msra.mxu1 %v865_v43  ;;  %v1090_v43 = vld [vmem:[#allocation2 + $0xb0] sm:$0xff] }
 0x433   :  { %v867_v46 = vsel %vm317_vm3, %v866_v45, 0.0  ;;  %1640 = vmatmul.mubr.msk.f32.vlgmr.msra.gmra.mrb[8].mxu1 %vm46_vm0, %v1897_v5 }
 0x434   :  { %v868_v47 = vrot.slane %v867_v46, 4  ;;  %1642 = vmatprep.mubr.msk.f32.mxu1 %vm46_vm0, %v1904_v8 }
 0x436   :  { %v869_v48 = vadd.f32 %v868_v47, %v867_v46 }
 0x437   :  { %1643 = vmatmul.mubr.msk.f32.gmra.mrb[10].mxu1 %vm46_vm0, %v1925_v13 }
 0x438   :  { %v870_v49 = vrot.slane %v869_v48, 2  ;;  %1655 = vmatprep.mubr.msk.f32.mxu1 %vm46_vm0, %v1889_v3 }
 0x43a   :  { %v871_v50 = vadd.f32 %v870_v49, %v869_v48 }
 0x43c   :  { %v872_v51 = vrot.slane %v871_v50, 1 }
 0x43e   :  { %v873_v25 = vadd.f32 %v872_v51, %v871_v50 }
 0x440   :  { %874 = vst.msk [vmem:[#allocation3 + $0x3] sm:$0x1] %vm492_vm4, %v873_v25 }
 0x506   :  { %v1641_v35 = vpop.f32.mrb[8].mxu1 }
 0x507   :  { %v966_v53 = vadd.f32 %v1641_v35, %v962_v52  ;;  %v941_v54 = vpop.f32.mrb[9].mxu1 }
 0x508   :  { %v965_v56 = vadd.f32 %v961_v55, %v941_v54 }
 0x509   :  { %v1529_v57 = vmul.f32 -1.442695, %v966_v53 }
 0x50a   :  { %v1528_v58 = vmul.f32 -1.442695, %v965_v56  ;;  %v1644_v59 = vpop.f32.mrb[10].mxu1 }
 0x50b   :  { %1745 = vpow2.f32 %v1529_v57  ;;  %v951_v60 = vpop.f32.mrb[11].mxu1  ;;  %v968_v2 = vadd.f32 %v1644_v59, %v964_v0 }
 0x50c   :  { %1747 = vpow2.f32 %v1528_v58  ;;  %v967_v63 = vadd.f32 %v963_v61, %v951_v60 }
 0x50e   :  { %v1530_v1 = vmul.f32 -1.442695, %v967_v63 }
 0x510   :  { %1749 = vpow2.f32 %v1530_v1 }
 0x511   :  { %1751 = vtanh.f32 %v968_v2 }
 0x515   :  { %v1746_v7 = vpop.eup %1745 }
 0x516   :  { %v1748_v27 = vpop.eup %1747  ;;  %v979_v37 = vadd.f32 1.0, %v1746_v7 }
 0x517   :  { %v978_v9 = vadd.f32 1.0, %v1748_v27 }
 0x518   :  { %1753 = vrcp.f32 %v979_v37 }
 0x519   :  { %1755 = vrcp.f32 %v978_v9  ;;  %v1216_v9 = vld [vmem:[#allocation2 + $0xc8] sm:$0xff] }
 0x51a   :  { %v1750_v10 = vpop.eup %1749 }
 0x51b   :  { %v1752_v62 = vpop.eup %1751  ;;  %v980_v11 = vadd.f32 1.0, %v1750_v10 }
 0x51d   :  { %1757 = vrcp.f32 %v980_v11 }
 0x522   :  { %v1754_v14 = vpop.eup %1753 }
 0x523   :  { %v1756_v15 = vpop.eup %1755  ;;  %v988_v6 = vmul.f32 %v1754_v14, %v863_v41  ;;  %v1215_v14 = vld [vmem:[#allocation2 + $0xc0] sm:$0xff] }
 0x524   :  { %v989_v16 = vmul.f32 %v1756_v15, %v1752_v62 }
 0x526   :  { %v990_v17 = vadd.f32 %v989_v16, %v988_v6  ;;  %v1217_v16 = vld [vmem:[#allocation2 + $0xd0] sm:$0xff] }
 0x527   :  { %v1758_v18 = vpop.eup %1757 }
 0x528   :  { %1759 = vtanh.f32 %v990_v17 }
 0x532   :  { %v1760_v19 = vpop.eup %1759 }
 0x533   :  { %v992_v20 = vmul.f32 %v1760_v19, %v1758_v18 }
 0x535   :  { %v993_v21 = vmul.f32 %v992_v20, %v2048_v44  ;;  %1645 = vmatprep.subr.mxu0 %v992_v20 }
 0x536   :  { %1646 = vmatpush3.msra.mxu0 %v992_v20 }
 0x537   :  { %v994_v22 = vsel %vm317_vm3, %v993_v21, 0.0  ;;  %1648 = vmatmul.mubr.msk.f32.vlgmr.msra.gmra.mrb[10].mxu0 %vm46_vm0, %v1897_v5 }
 0x538   :  { %v995_v23 = vrot.slane %v994_v22, 4  ;;  %1650 = vmatprep.mubr.msk.f32.mxu0 %vm46_vm0, %v1904_v8 }
 0x53a   :  { %v996_v24 = vadd.f32 %v995_v23, %v994_v22 }
 0x53b   :  { %1651 = vmatmul.mubr.msk.f32.gmra.mrb[12].mxu0 %vm46_vm0, %v1925_v13 }
 0x53c   :  { %v997_v26 = vrot.slane %v996_v24, 2  ;;  %1663 = vmatprep.mubr.msk.f32.mxu0 %vm46_vm0, %v1889_v3  ;;  %v1091_v3 = vld [vmem:[#allocation2 + $0xb8] sm:$0xff] }
 0x53e   :  { %v998_v30 = vadd.f32 %v997_v26, %v996_v24 }
 0x540   :  { %v999_v31 = vrot.slane %v998_v30, 1 }
 0x542   :  { %v1000_v32 = vadd.f32 %v999_v31, %v998_v30 }
 0x544   :  { %1001 = vst.msk [vmem:[#allocation3 + $0x4] sm:$0x1] %vm492_vm4, %v1000_v32 }
 0x60a   :  { %v1649_v28 = vpop.f32.mrb[10].mxu0 }
 0x60b   :  { %v1093_v33 = vadd.f32 %v1649_v28, %v1089_v29  ;;  %v1068_v34 = vpop.f32.mrb[11].mxu0 }
 0x60c   :  { %v1092_v39 = vadd.f32 %v1088_v38, %v1068_v34 }
 0x60d   :  { %v1536_v40 = vmul.f32 -1.442695, %v1093_v33 }
 0x60e   :  { %v1535_v41 = vmul.f32 -1.442695, %v1092_v39  ;;  %v1652_v42 = vpop.f32.mrb[12].mxu0 }
 0x60f   :  { %1761 = vpow2.f32 %v1536_v40  ;;  %v1078_v36 = vpop.f32.mrb[13].mxu0  ;;  %v1095_v47 = vadd.f32 %v1652_v42, %v1091_v3  ;;  %v1813_v42 = vld [vmem:[%s2155_s2 + $0x8] sm:$0xff]  ;;  %v1815_v3 = vld [vmem:[%s2155_s2 + $0x18] sm:$0xff] }
 0x610   :  { %1763 = vpow2.f32 %v1535_v41  ;;  %v1094_v45 = vadd.f32 %v1090_v43, %v1078_v36  ;;  %v1814_v43 = vld [vmem:[%s2155_s2 + $0x10] sm:$0xff] }
 0x612   :  { %v1537_v46 = vmul.f32 -1.442695, %v1094_v45 }
 0x614   :  { %1765 = vpow2.f32 %v1537_v46 }
 0x615   :  { %1767 = vtanh.f32 %v1095_v47 }
 0x619   :  { %v1762_v48 = vpop.eup %1761 }
 0x61a   :  { %v1764_v49 = vpop.eup %1763  ;;  %v1106_v50 = vadd.f32 1.0, %v1762_v48 }
 0x61b   :  { %v1105_v51 = vadd.f32 1.0, %v1764_v49 }
 0x61c   :  { %1769 = vrcp.f32 %v1106_v50 }
 0x61d   :  { %1771 = vrcp.f32 %v1105_v51  ;;  %v1343_v51 = vld [vmem:[#allocation2 + $0xe8] sm:$0xff] }
 0x61e   :  { %v1766_v25 = vpop.eup %1765 }
 0x61f   :  { %v1768_v35 = vpop.eup %1767  ;;  %v1107_v55 = vadd.f32 1.0, %v1766_v25 }
 0x621   :  { %1773 = vrcp.f32 %v1107_v55 }
 0x626   :  { %v1770_v52 = vpop.eup %1769 }
 0x627   :  { %v1772_v53 = vpop.eup %1771  ;;  %v1115_v54 = vmul.f32 %v1770_v52, %v990_v17  ;;  %v1342_v52 = vld [vmem:[#allocation2 + $0xe0] sm:$0xff] }
 0x628   :  { %v1116_v56 = vmul.f32 %v1772_v53, %v1768_v35 }
 0x62a   :  { %v1117_v57 = vadd.f32 %v1116_v56, %v1115_v54 }
 0x62b   :  { %v1774_v58 = vpop.eup %1773 }
 0x62c   :  { %1775 = vtanh.f32 %v1117_v57 }
 0x636   :  { %v1776_v59 = vpop.eup %1775 }
 0x637   :  { %v1119_v60 = vmul.f32 %v1776_v59, %v1774_v58  ;;  %v1344_v58 = vld [vmem:[#allocation2 + $0xf0] sm:$0xff] }
 0x639   :  { %v1120_v61 = vmul.f32 %v1119_v60, %v2048_v44  ;;  %1653 = vmatprep.subr.mxu1 %v1119_v60 }
 0x63a   :  { %1654 = vmatpush3.msra.mxu1 %v1119_v60  ;;  %v1345_v60 = vld [vmem:[#allocation2 + $0xf8] sm:$0xff] }
 0x63b   :  { %v1121_v63 = vsel %vm317_vm3, %v1120_v61, 0.0  ;;  %1656 = vmatmul.mubr.msk.f32.vlgmr.msra.gmra.mrb[12].mxu1 %vm46_vm0, %v1897_v5  ;;  %1669 = vmatprep.subr.mxu1 %v1840_v4 }
 0x63c   :  { %v1122_v0 = vrot.slane %v1121_v63, 4  ;;  %1658 = vmatprep.mubr.msk.f32.mxu1 %vm46_vm0, %v1904_v8 }
 0x63e   :  { %v1123_v1 = vadd.f32 %v1122_v0, %v1121_v63 }
 0x63f   :  { %1659 = vmatmul.mubr.msk.f32.gmra.mrb[14].mxu1 %vm46_vm0, %v1925_v13 }
 0x640   :  { %v1124_v2 = vrot.slane %v1123_v1, 2  ;;  %1671 = vmatprep.mubr.msk.f32.mxu1 %vm1841_vm1, %v1840_v4  ;;  %v1218_v4 = vld [vmem:[#allocation2 + $0xd8] sm:$0xff] }
 0x642   :  { %v1125_v7 = vadd.f32 %v1124_v2, %v1123_v1 }
 0x644   :  { %v1126_v27 = vrot.slane %v1125_v7, 1 }
 0x646   :  { %v1127_v37 = vadd.f32 %v1126_v27, %v1125_v7 }
 0x648   :  { %1128 = vst.msk [vmem:[#allocation3 + $0x5] sm:$0x1] %vm492_vm4, %v1127_v37 }
 0x70e   :  { %v1657_v5 = vpop.f32.mrb[12].mxu1 }
 0x70f   :  { %v1220_v10 = vadd.f32 %v1657_v5, %v1216_v9  ;;  %v1195_v62 = vpop.f32.mrb[13].mxu1 }
 0x710   :  { %v1219_v15 = vadd.f32 %v1215_v14, %v1195_v62 }
 0x711   :  { %v1543_v8 = vmul.f32 -1.442695, %v1220_v10 }
 0x712   :  { %v1542_v6 = vmul.f32 -1.442695, %v1219_v15  ;;  %v1660_v11 = vpop.f32.mrb[14].mxu1 }
 0x713   :  { %1777 = vpow2.f32 %v1543_v8  ;;  %v1205_v13 = vpop.f32.mrb[15].mxu1  ;;  %v1222_v19 = vadd.f32 %v1660_v11, %v1218_v4 }
 0x714   :  { %1779 = vpow2.f32 %v1542_v6  ;;  %v1221_v17 = vadd.f32 %v1217_v16, %v1205_v13 }
 0x716   :  { %v1544_v18 = vmul.f32 -1.442695, %v1221_v17 }
 0x718   :  { %1781 = vpow2.f32 %v1544_v18 }
 0x719   :  { %1783 = vtanh.f32 %v1222_v19 }
 0x71d   :  { %v1778_v20 = vpop.eup %1777 }
 0x71e   :  { %v1780_v21 = vpop.eup %1779  ;;  %v1233_v22 = vadd.f32 1.0, %v1778_v20 }
 0x71f   :  { %v1232_v23 = vadd.f32 1.0, %v1780_v21 }
 0x720   :  { %1785 = vrcp.f32 %v1233_v22 }
 0x721   :  { %1787 = vrcp.f32 %v1232_v23 }
 0x722   :  { %v1782_v24 = vpop.eup %1781 }
 0x723   :  { %v1784_v26 = vpop.eup %1783  ;;  %v1234_v28 = vadd.f32 1.0, %v1782_v24 }
 0x725   :  { %1789 = vrcp.f32 %v1234_v28 }
 0x72a   :  { %v1786_v30 = vpop.eup %1785 }
 0x72b   :  { %v1788_v31 = vpop.eup %1787  ;;  %v1242_v32 = vmul.f32 %v1786_v30, %v1117_v57  ;;  %v1469_v30 = vpop.permute.xlu1 %1468 }
 0x72c   :  { %v1243_v29 = vmul.f32 %v1788_v31, %v1784_v26 }
 0x72e   :  { %v1244_v33 = vadd.f32 %v1243_v29, %v1242_v32 }
 0x72f   :  { %v1790_v34 = vpop.eup %1789 }
 0x730   :  { %1791 = vtanh.f32 %v1244_v33 }
 0x73a   :  { %v1792_v38 = vpop.eup %1791 }
 0x73b   :  { %v1246_v39 = vmul.f32 %v1792_v38, %v1790_v34 }
 0x73d   :  { %v1247_v40 = vmul.f32 %v1246_v39, %v2048_v44  ;;  %1661 = vmatprep.subr.mxu0 %v1246_v39 }
 0x73e   :  { %1662 = vmatpush3.msra.mxu0 %v1246_v39 }
 0x73f   :  { %v1248_v41 = vsel %vm317_vm3, %v1247_v40, 0.0  ;;  %1664 = vmatmul.mubr.msk.f32.vlgmr.msra.gmra.mrb[14].mxu0 %vm46_vm0, %v1813_v42 }
 0x740   :  { %v1249_v36 = vrot.slane %v1248_v41, 4  ;;  %1666 = vmatprep.mubr.msk.f32.mxu0 %vm46_vm0, %v1814_v43 }
 0x742   :  { %v1250_v45 = vadd.f32 %v1249_v36, %v1248_v41 }
 0x743   :  { %1667 = vmatmul.mubr.msk.f32.gmra.mrb[16].mxu0 %vm46_vm0, %v1815_v3 }
 0x744   :  { %v1251_v46 = vrot.slane %v1250_v45, 2 }
 0x746   :  { %v1252_v47 = vadd.f32 %v1251_v46, %v1250_v45 }
 0x748   :  { %v1253_v48 = vrot.slane %v1252_v47, 1 }
 0x74a   :  { %v1254_v49 = vadd.f32 %v1253_v48, %v1252_v47 }
 0x74c   :  { %1255 = vst.msk [vmem:[#allocation3 + $0x6] sm:$0x1] %vm492_vm4, %v1254_v49 }
 0x812   :  { %v1665_v50 = vpop.f32.mrb[14].mxu0 }
 0x813   :  { %v1347_v25 = vadd.f32 %v1665_v50, %v1343_v51  ;;  %v1322_v35 = vpop.f32.mrb[15].mxu0 }
 0x814   :  { %v1346_v53 = vadd.f32 %v1342_v52, %v1322_v35 }
 0x815   :  { %v1550_v54 = vmul.f32 -1.442695, %v1347_v25 }
 0x816   :  { %v1549_v55 = vmul.f32 -1.442695, %v1346_v53  ;;  %v1668_v56 = vpop.f32.mrb[16].mxu0 }
 0x817   :  { %1793 = vpow2.f32 %v1550_v54  ;;  %v1332_v57 = vpop.f32.mrb[17].mxu0  ;;  %v1349_v63 = vadd.f32 %v1668_v56, %v1345_v60 }
 0x818   :  { %1795 = vpow2.f32 %v1549_v55  ;;  %v1348_v59 = vadd.f32 %v1344_v58, %v1332_v57 }
 0x81a   :  { %v1551_v61 = vmul.f32 -1.442695, %v1348_v59 }
 0x81c   :  { %1797 = vpow2.f32 %v1551_v61 }
 0x81d   :  { %1799 = vtanh.f32 %v1349_v63 }
 0x821   :  { %v1794_v0 = vpop.eup %1793 }
 0x822   :  { %v1796_v1 = vpop.eup %1795  ;;  %v1360_v2 = vadd.f32 1.0, %v1794_v0 }
 0x823   :  { %v1359_v7 = vadd.f32 1.0, %v1796_v1 }
 0x824   :  { %1801 = vrcp.f32 %v1360_v2 }
 0x825   :  { %1803 = vrcp.f32 %v1359_v7 }
 0x826   :  { %v1798_v27 = vpop.eup %1797 }
 0x827   :  { %v1800_v37 = vpop.eup %1799  ;;  %v1361_v62 = vadd.f32 1.0, %v1798_v27 }
 0x829   :  { %1805 = vrcp.f32 %v1361_v62 }
 0x82e   :  { %v1802_v5 = vpop.eup %1801 }
 0x82f   :  { %v1804_v9 = vpop.eup %1803  ;;  %v1369_v10 = vmul.f32 %v1802_v5, %v1244_v33 }
 0x830   :  { %v1370_v14 = vmul.f32 %v1804_v9, %v1800_v37 }
 0x832   :  { %v1371_v15 = vadd.f32 %v1370_v14, %v1369_v10 }
 0x833   :  { %v1806_v8 = vpop.eup %1805 }
 0x834   :  { %1807 = vtanh.f32 %v1371_v15 }
 0x83e   :  { %v1808_v6 = vpop.eup %1807 }
 0x83f   :  { %v1373_v11 = vmul.f32 %v1808_v6, %v1806_v8 }
 0x841   :  { %v1374_v13 = vmul.f32 %v1373_v11, %v2048_v44  ;;  %v1459_v44 = vld [vmem:[%s2153_s0] sm:$0x3] }
 0x843   :  { %v1375_v16 = vsel %vm317_vm3, %v1374_v13, 0.0 }
 0x844   :  { %v1376_v17 = vrot.slane %v1375_v16, 4 }
 0x846   :  { %v1377_v4 = vadd.f32 %v1376_v17, %v1375_v16 }
 0x848   :  { %v1378_v18 = vrot.slane %v1377_v4, 2 }
 0x84a   :  { %v1379_v19 = vadd.f32 %v1378_v18, %v1377_v4 }
 0x84c   :  { %v1380_v20 = vrot.slane %v1379_v19, 1 }
 0x84e   :  { %v1381_v21 = vadd.f32 %v1380_v20, %v1379_v19 }
 0x850   :  { %1382 = vst.msk [vmem:[#allocation3 + $0x7] sm:$0x1] %vm492_vm4, %v1381_v21 }
 0x857   :  { %v1383_v22 = vld [vmem:[#allocation3] sm:$0xff] }
 0x858   :  { %1670 = vmatpush3.xpose.msk.msra.mxu1 %vm317_vm3, %v1383_v22 }
 0x85b   :  { %1672 = vmatmul.mubr.msk.f32.vlgmr.msra.gmra.mrb[16].mxu1 %vm317_vm3, %v1918_v12 }
 0x92e   :  { %v1455_v23 = vpop.f32.mrb[16].mxu1 }
 0x92f   :  { %v1460_v24 = vadd.f32 %v1459_v44, %v1455_v23  ;;  %v1673_v26 = vpop.f32.mrb[17].mxu1 }
 0x931   :  { %v1471_v31 = vadd.f32 %v1469_v30, %v1460_v24 }
 0x933   :  { %v1555_v32 = vmul.f32 -1.442695, %v1471_v31 }
 0x935   :  { %1809 = vpow2.f32 %v1555_v32 }
 0x93f   :  { %v1810_v28 = vpop.eup %1809 }
 0x940   :  { %v1475_v29 = vadd.f32 1.0, %v1810_v28 }
 0x942   :  { %1811 = vrcp.f32 %v1475_v29 }
 0x94c   :  { %v1812_v33 = vpop.eup %1811 }
 0x94d   :  { %1479 = vst.msk [vmem:[#allocation5] sm:$0x3] %vm1478_vm5, %v1812_v33 }
 0x94e   :  { %1827 = shalt.err (!%p1824_p4)
}
 0x94f   :  { %s1828_s9 = scalar_lea.hbm %s2159_s6, 32 }
 0x950   :  { %p1829_p5 = scmp.ne.s32.totalorder %s2159_s6, %s1828_s9  ;;  %p1832_p6 = scmp.lt.u32.totalorder %s1828_s9, %s2159_s6 }
 0x952   :  { %p1834_p7 = pnand %p1832_p6, %p1829_p5 }
 0x954   :  { %1837 = shalt.err (!%p1834_p7)
}
 0x955   :  { %1489 = dma.vmem_to_hbm [thread:$0]  %s1487_s30, 32, %s2159_s6, [#allocation6]  }
 0x956   :  { %1838 = dma.done.wait [#allocation6], 32  }
 0x957   :  { %1839 = vsyncadd [#allocation6], 4294967264 }
 0x958   :  { %1493 = vsyncpa [#allocation6], 1 }

</bundles_post_ra>
